<compile_context>
chip_gen: v5e
topology: v5e:2x2
jax: 0.10.0
libtpu: 0.0.40
codegen_flags: <defaults>
</compile_context>

<pallas_src>
import functools
import math

import jax
import jax.numpy as jnp
import numpy as np
from jax.experimental import pallas as pl
from jax.experimental.pallas import tpu as pltpu

EPS = 1e-6
NEG_INF = -1e9


# ----------------------------------------------------------------------------
# shared in-kernel helpers
# ----------------------------------------------------------------------------
def _layernorm(x, gamma, beta):
    # x: (..., D) f32, gamma/beta broadcastable (1, D)
    mean = jnp.mean(x, axis=-1, keepdims=True)
    var = jnp.mean((x - mean) ** 2, axis=-1, keepdims=True)
    return (x - mean) * jax.lax.rsqrt(var + EPS) * gamma + beta


def _mha_block(x, kv, addmask, wq, wk, wv, wo, gamma, beta,
               *, n_head, d_k, d_v, scale):
    """Head-fused multi-head attention + residual + LayerNorm.

    x : (T, D) f32  (queries / residual source)
    kv: (S, D) f32
    addmask: f32 additive mask broadcastable to (T, S): 0.0 keep / -1e9 masked
    wq/wk: (D, H*d_k) bf16   wv: (D, H*d_v) bf16   wo: (H*d_v, D) bf16
    """
    xb = x.astype(jnp.bfloat16)
    kvb = kv.astype(jnp.bfloat16)

    # One wide matmul per projection: N = H*d_k (typically == D), lane-dense.
    q = jnp.dot(xb, wq, preferred_element_type=jnp.float32) * scale    # (T, H*dk)
    k = jnp.dot(kvb, wk, preferred_element_type=jnp.float32)           # (S, H*dk)
    v = jnp.dot(kvb, wv, preferred_element_type=jnp.float32)           # (S, H*dv)

    # Per-head scores / softmax / context (static unroll over heads; the
    # score and context matmuls are inherently per-head).
    ctx_heads = []
    for h in range(n_head):
        qh = q[:, h * d_k:(h + 1) * d_k].astype(jnp.bfloat16)          # (T, dk)
        kh = k[:, h * d_k:(h + 1) * d_k].astype(jnp.bfloat16)          # (S, dk)
        vh = v[:, h * d_v:(h + 1) * d_v].astype(jnp.bfloat16)          # (S, dv)
        s = jnp.einsum('te,se->ts', qh, kh,
                       preferred_element_type=jnp.float32)             # (T, S)
        s = s + addmask
        s = s - jnp.max(s, axis=-1, keepdims=True)
        p = jnp.exp(s)
        p = p * pl.reciprocal(jnp.sum(p, axis=-1, keepdims=True), approx=True)
        ctx_heads.append(jnp.dot(p.astype(jnp.bfloat16), vh,
                                 preferred_element_type=jnp.float32))  # (T, dv)

    ctx = jnp.concatenate(ctx_heads, axis=-1).astype(jnp.bfloat16)     # (T, H*dv)
    out = jnp.dot(ctx, wo, preferred_element_type=jnp.float32)         # (T, D)
    return _layernorm(out + x, gamma, beta)


# ----------------------------------------------------------------------------
# fused decoder kernel: grid = (batch, layer)
# ----------------------------------------------------------------------------
def decoder_layers_kernel(
        dec_ref, ln0_g_ref, ln0_b_ref, trg_valid_ref, src_valid_ref, enc_ref,
        swq_ref, swk_ref, swv_ref, swo_ref, sg_ref, sb_ref,
        cwq_ref, cwk_ref, cwv_ref, cwo_ref, cg_ref, cb_ref,
        fw1_ref, fb1_ref, fw2_ref, fb2_ref, fg_ref, fb_ref,
        o_ref, x_scr, mself_scr, mcross_scr,
        *, n_head, d_k, d_v, scale):
    layer = pl.program_id(1)
    T = dec_ref.shape[1]

    # layer 0 (per batch element): seed resident activation and masks
    @pl.when(layer == 0)
    def _init():
        # pos-enc already added in the wrapper; apply outer LayerNorm
        x_scr[...] = _layernorm(dec_ref[0], ln0_g_ref[...], ln0_b_ref[...])
        # layer-invariant additive masks (cached in VMEM scratch)
        row = jax.lax.broadcasted_iota(jnp.int32, (T, T), 0)
        col = jax.lax.broadcasted_iota(jnp.int32, (T, T), 1)
        keep_self = jnp.logical_and(row >= col, trg_valid_ref[0] > 0.0)   # (T, T)
        mself_scr[...] = jnp.where(keep_self, 0.0, NEG_INF)
        mcross_scr[...] = jnp.where(src_valid_ref[0] > 0.0, 0.0, NEG_INF)  # (1, S)

    x = x_scr[...]                                  # (T, D) f32, resident in VMEM

    # masked self-attention + residual + LN
    x = _mha_block(x, x, mself_scr[...],
                   swq_ref[0], swk_ref[0], swv_ref[0], swo_ref[0],
                   sg_ref[0], sb_ref[0],
                   n_head=n_head, d_k=d_k, d_v=d_v, scale=scale)
    # encoder-decoder attention + residual + LN
    x = _mha_block(x, enc_ref[0], mcross_scr[...],
                   cwq_ref[0], cwk_ref[0], cwv_ref[0], cwo_ref[0],
                   cg_ref[0], cb_ref[0],
                   n_head=n_head, d_k=d_k, d_v=d_v, scale=scale)
    # position-wise FFN + residual + LN
    h = jnp.dot(x.astype(jnp.bfloat16), fw1_ref[0],
                preferred_element_type=jnp.float32) + fb1_ref[0]
    h = jnp.maximum(h, 0.0)
    y = jnp.dot(h.astype(jnp.bfloat16), fw2_ref[0],
                preferred_element_type=jnp.float32) + fb2_ref[0]
    x = _layernorm(y + x, fg_ref[0], fb_ref[0])

    x_scr[...] = x

    # output block index is layer-invariant; only the last layer needs to write
    @pl.when(layer == pl.num_programs(1) - 1)
    def _store():
        o_ref[0] = x


# ----------------------------------------------------------------------------
# wrapper (mirrors Decoder.forward; dropout = identity / eval mode)
# ----------------------------------------------------------------------------
def decoder_forward(params, trg_seq, trg_valid, src_valid, enc_output, pos_table,
                    *, n_head, d_k, d_v, d_model, scale_emb=False):
    # TODO(synk): arbitrary user-supplied dense trg_mask/src_mask are not
    # supported; the standard pad&causal / pad masks are built in-kernel from
    # the compact validity vectors (matches the reference model's usual usage).
    B, T = trg_seq.shape
    S = enc_output.shape[1]
    D = d_model
    L = params['slf_wq'].shape[0]
    DI = params['ffn_w1'].shape[-1]
    HDK, HDV = n_head * d_k, n_head * d_v

    # embedding gather + positional encoding (glue, plain JAX)
    dec = jnp.take(params['emb'], trg_seq, axis=0)                 # (B, T, D) f32
    if scale_emb:
        dec = dec * (d_model ** 0.5)
    dec = dec + pos_table[:T][None]

    def batch_spec(shape):
        nrest = len(shape) - 1
        return pl.BlockSpec((1,) + tuple(shape[1:]),
                            lambda b, l: (b,) + (0,) * nrest)

    def layer_spec(shape):
        nrest = len(shape) - 1
        return pl.BlockSpec((1,) + tuple(shape[1:]),
                            lambda b, l: (l,) + (0,) * nrest)

    def const_spec(shape):
        n = len(shape)
        return pl.BlockSpec(tuple(shape), lambda b, l: (0,) * n)

    in_specs = [
        batch_spec((B, T, D)),                    # dec (embedded target + pos)
        const_spec((1, D)), const_spec((1, D)),   # outer LayerNorm gamma / beta
        batch_spec((B, 1, T)),                    # trg pad-validity
        batch_spec((B, 1, S)),                    # src pad-validity
        batch_spec((B, S, D)),                    # encoder output
        # self-attention (stacked over layers, streamed per layer step)
        layer_spec((L, D, HDK)), layer_spec((L, D, HDK)),
        layer_spec((L, D, HDV)), layer_spec((L, HDV, D)),
        layer_spec((L, 1, D)), layer_spec((L, 1, D)),
        # encoder-decoder attention
        layer_spec((L, D, HDK)), layer_spec((L, D, HDK)),
        layer_spec((L, D, HDV)), layer_spec((L, HDV, D)),
        layer_spec((L, 1, D)), layer_spec((L, 1, D)),
        # position-wise FFN
        layer_spec((L, D, DI)), layer_spec((L, 1, DI)),
        layer_spec((L, DI, D)), layer_spec((L, 1, D)),
        layer_spec((L, 1, D)), layer_spec((L, 1, D)),
    ]

    kernel = functools.partial(decoder_layers_kernel, n_head=n_head,
                               d_k=d_k, d_v=d_v, scale=1.0 / math.sqrt(d_k))

    # VMEM budget: double-buffered per-layer weight stream + per-batch blocks
    # + scratch + attention intermediates; clamp to 64 MiB (v7x physical).
    w_layer = 2 * (2 * (2 * D * HDK + D * HDV + HDV * D) + D * DI + DI * D)
    blocks = 4 * (2 * T * D + S * D + T + S + 6 * D + 2 * DI)
    interm = 4 * (T * (HDK + DI + 4 * D) + S * (HDK + HDV) + 4 * T * max(T, S))
    scratch = 4 * (T * D + T * T + S)
    est = 2 * (w_layer + blocks) + interm + scratch + (2 << 20)
    vmem_limit = int(min(max(est, 32 << 20), 64 << 20))

    flops = 2 * B * L * (T * D * (2 * HDK + HDV) + S * D * (HDK + HDV)
                         + 2 * T * HDV * D
                         + n_head * T * (T + S) * (d_k + d_v)
                         + 2 * T * D * DI)
    cost = pl.CostEstimate(
        flops=int(flops),
        transcendentals=int(B * L * n_head * T * (T + S)),
        bytes_accessed=int(B * L * w_layer + 4 * B * (3 * T * D + S * D)))

    out = pl.pallas_call(
        kernel,
        out_shape=jax.ShapeDtypeStruct((B, T, D), jnp.float32),
        grid=(B, L),
        in_specs=in_specs,
        out_specs=batch_spec((B, T, D)),
        scratch_shapes=[pltpu.VMEM((T, D), jnp.float32),   # resident activation
                        pltpu.VMEM((T, T), jnp.float32),   # cached self mask
                        pltpu.VMEM((1, S), jnp.float32)],  # cached cross mask
        compiler_params=pltpu.CompilerParams(
            dimension_semantics=("parallel", "arbitrary"),
            vmem_limit_bytes=vmem_limit),
        cost_estimate=cost,
    )(dec, params['ln0_g'], params['ln0_b'], trg_valid, src_valid, enc_output,
      params['slf_wq'], params['slf_wk'], params['slf_wv'], params['slf_wo'],
      params['slf_ln_g'], params['slf_ln_b'],
      params['enc_wq'], params['enc_wk'], params['enc_wv'], params['enc_wo'],
      params['enc_ln_g'], params['enc_ln_b'],
      params['ffn_w1'], params['ffn_b1'], params['ffn_w2'], params['ffn_b2'],
      params['ffn_ln_g'], params['ffn_ln_b'])
    return (out,)


# ----------------------------------------------------------------------------
# pure-JAX reference (f32) for correctness check
# ----------------------------------------------------------------------------
def decoder_reference(params, trg_seq, trg_valid, src_valid, enc_output, pos_table,
                      *, n_head, d_k, d_v, d_model, scale_emb=False):
    B, T = trg_seq.shape
    f32 = lambda a: a.astype(jnp.float32)
    scale = 1.0 / math.sqrt(d_k)

    dec = jnp.take(params['emb'], trg_seq, axis=0)
    if scale_emb:
        dec = dec * (d_model ** 0.5)
    x = _layernorm(dec + pos_table[:T][None], params['ln0_g'], params['ln0_b'])

    causal = jnp.tril(jnp.ones((T, T), dtype=bool))
    keep_self = jnp.logical_and(causal[None], (trg_valid[:, 0, :] > 0)[:, None, :])
    self_add = jnp.where(keep_self, 0.0, NEG_INF)[:, None]          # (B,1,T,T)
    cross_add = jnp.where(src_valid > 0, 0.0, NEG_INF)[:, None]     # (B,1,1,S)

    def mha(x, kv, addmask, wq, wk, wv, wo, g, b):
        Bq, Tq, _ = x.shape
        Sk = kv.shape[1]
        q = (x @ f32(wq)).reshape(Bq, Tq, n_head, d_k) * scale
        k = (kv @ f32(wk)).reshape(Bq, Sk, n_head, d_k)
        v = (kv @ f32(wv)).reshape(Bq, Sk, n_head, d_v)
        s = jnp.einsum('bthe,bshe->bhts', q, k) + addmask
        p = jax.nn.softmax(s, axis=-1)
        ctx = jnp.einsum('bhts,bshe->bthe', p, v).reshape(Bq, Tq, n_head * d_v)
        out = ctx @ f32(wo)
        return _layernorm(out + x, g, b)

    L = params['slf_wq'].shape[0]
    for i in range(L):
        x = mha(x, x, self_add,
                params['slf_wq'][i], params['slf_wk'][i], params['slf_wv'][i],
                params['slf_wo'][i], params['slf_ln_g'][i], params['slf_ln_b'][i])
        x = mha(x, enc_output, cross_add,
                params['enc_wq'][i], params['enc_wk'][i], params['enc_wv'][i],
                params['enc_wo'][i], params['enc_ln_g'][i], params['enc_ln_b'][i])
        h = jnp.maximum(x @ f32(params['ffn_w1'][i]) + params['ffn_b1'][i], 0.0)
        y = h @ f32(params['ffn_w2'][i]) + params['ffn_b2'][i]
        x = _layernorm(y + x, params['ffn_ln_g'][i], params['ffn_ln_b'][i])
    return x


# ----------------------------------------------------------------------------
# parameter construction (deterministic, synthetic)
# ----------------------------------------------------------------------------
def sinusoid_table(n_position, d_hid):
    pos = np.arange(n_position, dtype=np.float64)[:, None]
    j = np.arange(d_hid, dtype=np.float64)[None, :]
    angle = pos / np.power(10000.0, 2.0 * (np.floor(j / 2.0)) / d_hid)
    table = np.zeros((n_position, d_hid), dtype=np.float64)
    table[:, 0::2] = np.sin(angle[:, 0::2])
    table[:, 1::2] = np.cos(angle[:, 1::2])
    return jnp.asarray(table, dtype=jnp.float32)


def init_params(key, *, n_trg_vocab, d_word_vec, n_layers, n_head, d_k, d_v,
                d_model, d_inner, pad_idx):
    ks = iter(jax.random.split(key, 11))

    def normal(k, shape, scale=0.02):
        return scale * jax.random.normal(k, shape, dtype=jnp.float32)

    def wgt(k, shape):  # matmul weights stored bf16 (MXU-native), lane-dense
        return normal(k, shape).astype(jnp.bfloat16)

    emb = normal(next(ks), (n_trg_vocab, d_word_vec))
    emb = emb.at[pad_idx].set(0.0)      # nn.Embedding padding_idx row is zero

    L, H, D, DI = n_layers, n_head, d_model, d_inner
    ones = lambda s: jnp.ones(s, jnp.float32)
    zeros = lambda s: jnp.zeros(s, jnp.float32)
    return {
        'emb': emb,
        'ln0_g': ones((1, D)), 'ln0_b': zeros((1, D)),
        # self-attention (head-fused layouts)
        'slf_wq': wgt(next(ks), (L, D, H * d_k)),
        'slf_wk': wgt(next(ks), (L, D, H * d_k)),
        'slf_wv': wgt(next(ks), (L, D, H * d_v)),
        'slf_wo': wgt(next(ks), (L, H * d_v, D)),
        'slf_ln_g': ones((L, 1, D)), 'slf_ln_b': zeros((L, 1, D)),
        # encoder-decoder attention
        'enc_wq': wgt(next(ks), (L, D, H * d_k)),
        'enc_wk': wgt(next(ks), (L, D, H * d_k)),
        'enc_wv': wgt(next(ks), (L, D, H * d_v)),
        'enc_wo': wgt(next(ks), (L, H * d_v, D)),
        'enc_ln_g': ones((L, 1, D)), 'enc_ln_b': zeros((L, 1, D)),
        # position-wise FFN
        'ffn_w1': wgt(next(ks), (L, D, DI)), 'ffn_b1': zeros((L, 1, DI)),
        'ffn_w2': wgt(next(ks), (L, DI, D)), 'ffn_b2': zeros((L, 1, D)),
        'ffn_ln_g': ones((L, 1, D)), 'ffn_ln_b': zeros((L, 1, D)),
    }


# ----------------------------------------------------------------------------
if __name__ == "__main__":
    # small synthetic config
    n_trg_vocab, d_word_vec, d_model = 50, 32, 32
    n_layers, n_head, d_k, d_v, d_inner = 2, 4, 8, 8, 64
    pad_idx, n_position = 0, 200
    B, T, S = 2, 8, 10

    key = jax.random.PRNGKey(0)
    kp, kt, ke, ks = jax.random.split(key, 4)

    params = init_params(kp, n_trg_vocab=n_trg_vocab, d_word_vec=d_word_vec,
                         n_layers=n_layers, n_head=n_head, d_k=d_k, d_v=d_v,
                         d_model=d_model, d_inner=d_inner, pad_idx=pad_idx)
    pos_table = sinusoid_table(n_position, d_word_vec)

    # target sequence with some padding
    trg_seq = jax.random.randint(kt, (B, T), 1, n_trg_vocab, dtype=jnp.int32)
    trg_seq = trg_seq.at[0, -2:].set(pad_idx)
    trg_valid = (trg_seq != pad_idx).astype(jnp.float32)[:, None, :]    # (B,1,T)

    # encoder output + src validity (B, 1, S)
    enc_output = jax.random.normal(ke, (B, S, d_model), dtype=jnp.float32)
    src_seq_valid = jax.random.randint(ks, (B, S), 0, 2, dtype=jnp.int32)
    src_seq_valid = src_seq_valid.at[:, 0].set(1)             # keep at least one
    src_valid = (src_seq_valid != 0).astype(jnp.float32)[:, None, :]    # (B,1,S)

    (out,) = decoder_forward(params, trg_seq, trg_valid, src_valid, enc_output,
                             pos_table, n_head=n_head, d_k=d_k, d_v=d_v,
                             d_model=d_model, scale_emb=False)
    out = jax.block_until_ready(out)

    ref = decoder_reference(params, trg_seq, trg_valid, src_valid, enc_output,
                            pos_table, n_head=n_head, d_k=d_k, d_v=d_v,
                            d_model=d_model, scale_emb=False)

    assert out.shape == (B, T, d_model)
    assert bool(jnp.all(jnp.isfinite(out)))
    np.testing.assert_allclose(np.asarray(out), np.asarray(ref),
                               rtol=2e-2, atol=2e-2)
    print("KERNEL_OK")
</pallas_src>

<mosaic_0001>
module attributes {stable_mosaic.version = 11 : i64} {
  func.func @decoder_layers_kernel(%arg0: i32, %arg1: i32, %arg2: memref<1x8x32xf32, #tpu.memory_space<vmem>>, %arg3: memref<1x32xf32, #tpu.memory_space<vmem>>, %arg4: memref<1x32xf32, #tpu.memory_space<vmem>>, %arg5: memref<1x1x8xf32, #tpu.memory_space<vmem>>, %arg6: memref<1x1x10xf32, #tpu.memory_space<vmem>>, %arg7: memref<1x10x32xf32, #tpu.memory_space<vmem>>, %arg8: memref<1x32x32xbf16, #tpu.memory_space<vmem>>, %arg9: memref<1x32x32xbf16, #tpu.memory_space<vmem>>, %arg10: memref<1x32x32xbf16, #tpu.memory_space<vmem>>, %arg11: memref<1x32x32xbf16, #tpu.memory_space<vmem>>, %arg12: memref<1x1x32xf32, #tpu.memory_space<vmem>>, %arg13: memref<1x1x32xf32, #tpu.memory_space<vmem>>, %arg14: memref<1x32x32xbf16, #tpu.memory_space<vmem>>, %arg15: memref<1x32x32xbf16, #tpu.memory_space<vmem>>, %arg16: memref<1x32x32xbf16, #tpu.memory_space<vmem>>, %arg17: memref<1x32x32xbf16, #tpu.memory_space<vmem>>, %arg18: memref<1x1x32xf32, #tpu.memory_space<vmem>>, %arg19: memref<1x1x32xf32, #tpu.memory_space<vmem>>, %arg20: memref<1x32x64xbf16, #tpu.memory_space<vmem>>, %arg21: memref<1x1x64xf32, #tpu.memory_space<vmem>>, %arg22: memref<1x64x32xbf16, #tpu.memory_space<vmem>>, %arg23: memref<1x1x32xf32, #tpu.memory_space<vmem>>, %arg24: memref<1x1x32xf32, #tpu.memory_space<vmem>>, %arg25: memref<1x1x32xf32, #tpu.memory_space<vmem>>, %arg26: memref<1x8x32xf32, #tpu.memory_space<vmem>>, %arg27: memref<8x32xf32, #tpu.memory_space<vmem>>, %arg28: memref<8x8xf32, #tpu.memory_space<vmem>>, %arg29: memref<1x10xf32, #tpu.memory_space<vmem>>) attributes {dimension_semantics = [#tpu.dimension_semantics<parallel>, #tpu.dimension_semantics<arbitrary>], iteration_bounds = array<i64: 2, 2>, scalar_prefetch = 0 : i64, scratch_operands = 3 : i64, tpu.core_type = #tpu.core_type<tc>, window_params = [{transform_indices = @transform_0, window_bounds = array<i64: 1, 8, 32>}, {pipeline_mode = #tpu.pipeline_mode<synchronous>, transform_indices = @transform_1, window_bounds = array<i64: 1, 32>}, {pipeline_mode = #tpu.pipeline_mode<synchronous>, transform_indices = @transform_2, window_bounds = array<i64: 1, 32>}, {transform_indices = @transform_3, window_bounds = array<i64: 1, 1, 8>}, {transform_indices = @transform_4, window_bounds = array<i64: 1, 1, 10>}, {transform_indices = @transform_5, window_bounds = array<i64: 1, 10, 32>}, {transform_indices = @transform_6, window_bounds = array<i64: 1, 32, 32>}, {transform_indices = @transform_7, window_bounds = array<i64: 1, 32, 32>}, {transform_indices = @transform_8, window_bounds = array<i64: 1, 32, 32>}, {transform_indices = @transform_9, window_bounds = array<i64: 1, 32, 32>}, {transform_indices = @transform_10, window_bounds = array<i64: 1, 1, 32>}, {transform_indices = @transform_11, window_bounds = array<i64: 1, 1, 32>}, {transform_indices = @transform_12, window_bounds = array<i64: 1, 32, 32>}, {transform_indices = @transform_13, window_bounds = array<i64: 1, 32, 32>}, {transform_indices = @transform_14, window_bounds = array<i64: 1, 32, 32>}, {transform_indices = @transform_15, window_bounds = array<i64: 1, 32, 32>}, {transform_indices = @transform_16, window_bounds = array<i64: 1, 1, 32>}, {transform_indices = @transform_17, window_bounds = array<i64: 1, 1, 32>}, {transform_indices = @transform_18, window_bounds = array<i64: 1, 32, 64>}, {transform_indices = @transform_19, window_bounds = array<i64: 1, 1, 64>}, {transform_indices = @transform_20, window_bounds = array<i64: 1, 64, 32>}, {transform_indices = @transform_21, window_bounds = array<i64: 1, 1, 32>}, {transform_indices = @transform_22, window_bounds = array<i64: 1, 1, 32>}, {transform_indices = @transform_23, window_bounds = array<i64: 1, 1, 32>}, {transform_indices = @transform_24, window_bounds = array<i64: 1, 8, 32>}]} {
    %c0_i32 = arith.constant 0 : i32
    %0 = arith.cmpi eq, %arg1, %c0_i32 : i32
    %1 = arith.extui %0 : i1 to i32
    %c0_i32_0 = arith.constant 0 : i32
    %2 = arith.cmpi ne, %1, %c0_i32_0 : i32
    scf.if %2 {
      %c0_125 = arith.constant 0 : index
      %c0_126 = arith.constant 0 : index
      %c0_127 = arith.constant 0 : index
      %311 = vector.load %arg2[%c0_125, %c0_126, %c0_127] : memref<1x8x32xf32, #tpu.memory_space<vmem>>, vector<1x8x32xf32>
      %312 = vector.shape_cast %311 : vector<1x8x32xf32> to vector<8x32xf32>
      %c0_128 = arith.constant 0 : index
      %c0_129 = arith.constant 0 : index
      %313 = vector.load %arg3[%c0_128, %c0_129] : memref<1x32xf32, #tpu.memory_space<vmem>>, vector<1x32xf32>
      %c0_130 = arith.constant 0 : index
      %c0_131 = arith.constant 0 : index
      %314 = vector.load %arg4[%c0_130, %c0_131] : memref<1x32xf32, #tpu.memory_space<vmem>>, vector<1x32xf32>
      %cst_132 = arith.constant dense<0.000000e+00> : vector<8xf32>
      %315 = vector.multi_reduction <add>, %312, %cst_132 [1] : vector<8x32xf32> to vector<8xf32>
      %316 = vector.shape_cast %315 : vector<8xf32> to vector<8x1xf32>
      %cst_133 = arith.constant 3.200000e+01 : f32
      %317 = vector.broadcast %cst_133 : f32 to vector<8x1xf32>
      %318 = arith.divf %316, %317 : vector<8x1xf32>
      %319 = vector.broadcast %318 : vector<8x1xf32> to vector<8x32xf32>
      %320 = arith.subf %312, %319 : vector<8x32xf32>
      %321 = arith.mulf %320, %320 : vector<8x32xf32>
      %cst_134 = arith.constant dense<0.000000e+00> : vector<8xf32>
      %322 = vector.multi_reduction <add>, %321, %cst_134 [1] : vector<8x32xf32> to vector<8xf32>
      %323 = vector.shape_cast %322 : vector<8xf32> to vector<8x1xf32>
      %cst_135 = arith.constant 3.200000e+01 : f32
      %324 = vector.broadcast %cst_135 : f32 to vector<8x1xf32>
      %325 = arith.divf %323, %324 : vector<8x1xf32>
      %326 = vector.broadcast %318 : vector<8x1xf32> to vector<8x32xf32>
      %327 = arith.subf %312, %326 : vector<8x32xf32>
      %cst_136 = arith.constant 9.99999997E-7 : f32
      %328 = vector.broadcast %cst_136 : f32 to vector<8x1xf32>
      %329 = arith.addf %325, %328 : vector<8x1xf32>
      %330 = math.rsqrt %329 : vector<8x1xf32>
      %331 = vector.broadcast %330 : vector<8x1xf32> to vector<8x32xf32>
      %332 = arith.mulf %327, %331 : vector<8x32xf32>
      %333 = vector.broadcast %313 : vector<1x32xf32> to vector<8x32xf32>
      %334 = arith.mulf %332, %333 : vector<8x32xf32>
      %335 = vector.broadcast %314 : vector<1x32xf32> to vector<8x32xf32>
      %336 = arith.addf %334, %335 : vector<8x32xf32>
      %c0_137 = arith.constant 0 : index
      %c0_138 = arith.constant 0 : index
      %337 = vector.load %arg27[%c0_137, %c0_138] : memref<8x32xf32, #tpu.memory_space<vmem>>, vector<8x32xf32>
      tpu.vector_store %arg27[%c0_137, %c0_138], %336 {strides = array<i32>} : memref<8x32xf32, #tpu.memory_space<vmem>>, vector<8x32xf32>,
      %338 = tpu.iota {dimensions = array<i32: 0>} : vector<8x8xi32>
      %339 = tpu.iota {dimensions = array<i32: 1>} : vector<8x8xi32>
      %340 = arith.cmpi sge, %338, %339 : vector<8x8xi32>
      %c0_139 = arith.constant 0 : index
      %c0_140 = arith.constant 0 : index
      %c0_141 = arith.constant 0 : index
      %341 = vector.load %arg5[%c0_139, %c0_140, %c0_141] : memref<1x1x8xf32, #tpu.memory_space<vmem>>, vector<1x1x8xf32>
      %342 = vector.shape_cast %341 : vector<1x1x8xf32> to vector<1x8xf32>
      %cst_142 = arith.constant 0.000000e+00 : f32
      %343 = vector.broadcast %cst_142 : f32 to vector<1x8xf32>
      %344 = arith.cmpf ogt, %342, %343 : vector<1x8xf32>
      %345 = vector.broadcast %344 : vector<1x8xi1> to vector<8x8xi1>
      %346 = arith.andi %340, %345 : vector<8x8xi1>
      %cst_143 = arith.constant 0.000000e+00 : f32
      %cst_144 = arith.constant -1.000000e+09 : f32
      %347 = vector.broadcast %cst_143 : f32 to vector<8x8xf32>
      %348 = vector.broadcast %cst_144 : f32 to vector<8x8xf32>
      %349 = arith.select %346, %347, %348 : vector<8x8xi1>, vector<8x8xf32>
      %c0_145 = arith.constant 0 : index
      %c0_146 = arith.constant 0 : index
      %350 = vector.load %arg28[%c0_145, %c0_146] : memref<8x8xf32, #tpu.memory_space<vmem>>, vector<8x8xf32>
      tpu.vector_store %arg28[%c0_145, %c0_146], %349 {strides = array<i32>} : memref<8x8xf32, #tpu.memory_space<vmem>>, vector<8x8xf32>,
      %c0_147 = arith.constant 0 : index
      %c0_148 = arith.constant 0 : index
      %c0_149 = arith.constant 0 : index
      %351 = vector.load %arg6[%c0_147, %c0_148, %c0_149] : memref<1x1x10xf32, #tpu.memory_space<vmem>>, vector<1x1x10xf32>
      %352 = vector.shape_cast %351 : vector<1x1x10xf32> to vector<1x10xf32>
      %cst_150 = arith.constant 0.000000e+00 : f32
      %353 = vector.broadcast %cst_150 : f32 to vector<1x10xf32>
      %354 = arith.cmpf ogt, %352, %353 : vector<1x10xf32>
      %cst_151 = arith.constant 0.000000e+00 : f32
      %cst_152 = arith.constant -1.000000e+09 : f32
      %355 = vector.broadcast %cst_151 : f32 to vector<1x10xf32>
      %356 = vector.broadcast %cst_152 : f32 to vector<1x10xf32>
      %357 = arith.select %354, %355, %356 : vector<1x10xi1>, vector<1x10xf32>
      %c0_153 = arith.constant 0 : index
      %c0_154 = arith.constant 0 : index
      %358 = vector.load %arg29[%c0_153, %c0_154] : memref<1x10xf32, #tpu.memory_space<vmem>>, vector<1x10xf32>
      tpu.vector_store %arg29[%c0_153, %c0_154], %357 {strides = array<i32>} : memref<1x10xf32, #tpu.memory_space<vmem>>, vector<1x10xf32>,
    } else {
    }
    %c0 = arith.constant 0 : index
    %c0_1 = arith.constant 0 : index
    %3 = vector.load %arg27[%c0, %c0_1] : memref<8x32xf32, #tpu.memory_space<vmem>>, vector<8x32xf32>
    %c0_2 = arith.constant 0 : index
    %c0_3 = arith.constant 0 : index
    %4 = vector.load %arg28[%c0_2, %c0_3] : memref<8x8xf32, #tpu.memory_space<vmem>>, vector<8x8xf32>
    %c0_4 = arith.constant 0 : index
    %c0_5 = arith.constant 0 : index
    %c0_6 = arith.constant 0 : index
    %5 = vector.load %arg8[%c0_4, %c0_5, %c0_6] : memref<1x32x32xbf16, #tpu.memory_space<vmem>>, vector<1x32x32xbf16>
    %6 = vector.shape_cast %5 : vector<1x32x32xbf16> to vector<32x32xbf16>
    %c0_7 = arith.constant 0 : index
    %c0_8 = arith.constant 0 : index
    %c0_9 = arith.constant 0 : index
    %7 = vector.load %arg9[%c0_7, %c0_8, %c0_9] : memref<1x32x32xbf16, #tpu.memory_space<vmem>>, vector<1x32x32xbf16>
    %8 = vector.shape_cast %7 : vector<1x32x32xbf16> to vector<32x32xbf16>
    %c0_10 = arith.constant 0 : index
    %c0_11 = arith.constant 0 : index
    %c0_12 = arith.constant 0 : index
    %9 = vector.load %arg10[%c0_10, %c0_11, %c0_12] : memref<1x32x32xbf16, #tpu.memory_space<vmem>>, vector<1x32x32xbf16>
    %10 = vector.shape_cast %9 : vector<1x32x32xbf16> to vector<32x32xbf16>
    %c0_13 = arith.constant 0 : index
    %c0_14 = arith.constant 0 : index
    %c0_15 = arith.constant 0 : index
    %11 = vector.load %arg11[%c0_13, %c0_14, %c0_15] : memref<1x32x32xbf16, #tpu.memory_space<vmem>>, vector<1x32x32xbf16>
    %12 = vector.shape_cast %11 : vector<1x32x32xbf16> to vector<32x32xbf16>
    %c0_16 = arith.constant 0 : index
    %c0_17 = arith.constant 0 : index
    %c0_18 = arith.constant 0 : index
    %13 = vector.load %arg12[%c0_16, %c0_17, %c0_18] : memref<1x1x32xf32, #tpu.memory_space<vmem>>, vector<1x1x32xf32>
    %14 = vector.shape_cast %13 : vector<1x1x32xf32> to vector<1x32xf32>
    %c0_19 = arith.constant 0 : index
    %c0_20 = arith.constant 0 : index
    %c0_21 = arith.constant 0 : index
    %15 = vector.load %arg13[%c0_19, %c0_20, %c0_21] : memref<1x1x32xf32, #tpu.memory_space<vmem>>, vector<1x1x32xf32>
    %16 = vector.shape_cast %15 : vector<1x1x32xf32> to vector<1x32xf32>
    %17 = arith.truncf %3 : vector<8x32xf32> to vector<8x32xbf16>
    %18 = arith.truncf %3 : vector<8x32xf32> to vector<8x32xbf16>
    %cst = arith.constant dense<0.000000e+00> : vector<8x32xf32>
    %19 = tpu.matmul %17, %6, %cst {dimension_numbers = #tpu.dot_dimension_numbers<[1], [0], [0], [1], [0, 0, 1, 1], [], []>} : vector<8x32xbf16>, vector<32x32xbf16>, vector<8x32xf32> -> vector<8x32xf32>
    %cst_22 = arith.constant 0.353553385 : f32
    %20 = vector.broadcast %cst_22 : f32 to vector<8x32xf32>
    %21 = arith.mulf %19, %20 : vector<8x32xf32>
    %cst_23 = arith.constant dense<0.000000e+00> : vector<8x32xf32>
    %22 = tpu.matmul %18, %8, %cst_23 {dimension_numbers = #tpu.dot_dimension_numbers<[1], [0], [0], [1], [0, 0, 1, 1], [], []>} : vector<8x32xbf16>, vector<32x32xbf16>, vector<8x32xf32> -> vector<8x32xf32>
    %cst_24 = arith.constant dense<0.000000e+00> : vector<8x32xf32>
    %23 = tpu.matmul %18, %10, %cst_24 {dimension_numbers = #tpu.dot_dimension_numbers<[1], [0], [0], [1], [0, 0, 1, 1], [], []>} : vector<8x32xbf16>, vector<32x32xbf16>, vector<8x32xf32> -> vector<8x32xf32>
    %24 = vector.extract_strided_slice %21 {offsets = [0, 0], sizes = [8, 8], strides = [1, 1]} : vector<8x32xf32> to vector<8x8xf32>
    %25 = arith.truncf %24 : vector<8x8xf32> to vector<8x8xbf16>
    %26 = vector.extract_strided_slice %22 {offsets = [0, 0], sizes = [8, 8], strides = [1, 1]} : vector<8x32xf32> to vector<8x8xf32>
    %27 = arith.truncf %26 : vector<8x8xf32> to vector<8x8xbf16>
    %28 = vector.extract_strided_slice %23 {offsets = [0, 0], sizes = [8, 8], strides = [1, 1]} : vector<8x32xf32> to vector<8x8xf32>
    %29 = arith.truncf %28 : vector<8x8xf32> to vector<8x8xbf16>
    "tpu.trace_start"() <{level = 10 : i32, message = "te,se->ts"}> : () -> ()
    %cst_25 = arith.constant dense<0.000000e+00> : vector<8x8xf32>
    %30 = tpu.matmul %25, %27, %cst_25 {dimension_numbers = #tpu.dot_dimension_numbers<[1], [1], [0], [0], [0, 0, 1, 0], [], []>} : vector<8x8xbf16>, vector<8x8xbf16>, vector<8x8xf32> -> vector<8x8xf32>
    "tpu.trace_stop"() : () -> ()
    %31 = arith.addf %30, %4 : vector<8x8xf32>
    %cst_26 = arith.constant dense<0xFF800000> : vector<8xf32>
    %32 = vector.multi_reduction <maximumf>, %31, %cst_26 [1] : vector<8x8xf32> to vector<8xf32>
    %33 = vector.shape_cast %32 : vector<8xf32> to vector<8x1xf32>
    %34 = vector.broadcast %33 : vector<8x1xf32> to vector<8x8xf32>
    %35 = arith.subf %31, %34 : vector<8x8xf32>
    %36 = math.exp %35 : vector<8x8xf32>
    %cst_27 = arith.constant dense<0.000000e+00> : vector<8xf32>
    %37 = vector.multi_reduction <add>, %36, %cst_27 [1] : vector<8x8xf32> to vector<8xf32>
    %38 = vector.shape_cast %37 : vector<8xf32> to vector<8x1xf32>
    %39 = tpu.reciprocal %38 {approx = true} : vector<8x1xf32> -> vector<8x1xf32>
    %40 = vector.broadcast %39 : vector<8x1xf32> to vector<8x8xf32>
    %41 = arith.mulf %36, %40 : vector<8x8xf32>
    %42 = arith.truncf %41 : vector<8x8xf32> to vector<8x8xbf16>
    %cst_28 = arith.constant dense<0.000000e+00> : vector<8x8xf32>
    %43 = tpu.matmul %42, %29, %cst_28 {dimension_numbers = #tpu.dot_dimension_numbers<[1], [0], [0], [1], [0, 0, 1, 1], [], []>} : vector<8x8xbf16>, vector<8x8xbf16>, vector<8x8xf32> -> vector<8x8xf32>
    %44 = vector.extract_strided_slice %21 {offsets = [0, 8], sizes = [8, 8], strides = [1, 1]} : vector<8x32xf32> to vector<8x8xf32>
    %45 = arith.truncf %44 : vector<8x8xf32> to vector<8x8xbf16>
    %46 = vector.extract_strided_slice %22 {offsets = [0, 8], sizes = [8, 8], strides = [1, 1]} : vector<8x32xf32> to vector<8x8xf32>
    %47 = arith.truncf %46 : vector<8x8xf32> to vector<8x8xbf16>
    %48 = vector.extract_strided_slice %23 {offsets = [0, 8], sizes = [8, 8], strides = [1, 1]} : vector<8x32xf32> to vector<8x8xf32>
    %49 = arith.truncf %48 : vector<8x8xf32> to vector<8x8xbf16>
    "tpu.trace_start"() <{level = 10 : i32, message = "te,se->ts"}> : () -> ()
    %cst_29 = arith.constant dense<0.000000e+00> : vector<8x8xf32>
    %50 = tpu.matmul %45, %47, %cst_29 {dimension_numbers = #tpu.dot_dimension_numbers<[1], [1], [0], [0], [0, 0, 1, 0], [], []>} : vector<8x8xbf16>, vector<8x8xbf16>, vector<8x8xf32> -> vector<8x8xf32>
    "tpu.trace_stop"() : () -> ()
    %51 = arith.addf %50, %4 : vector<8x8xf32>
    %cst_30 = arith.constant dense<0xFF800000> : vector<8xf32>
    %52 = vector.multi_reduction <maximumf>, %51, %cst_30 [1] : vector<8x8xf32> to vector<8xf32>
    %53 = vector.shape_cast %52 : vector<8xf32> to vector<8x1xf32>
    %54 = vector.broadcast %53 : vector<8x1xf32> to vector<8x8xf32>
    %55 = arith.subf %51, %54 : vector<8x8xf32>
    %56 = math.exp %55 : vector<8x8xf32>
    %cst_31 = arith.constant dense<0.000000e+00> : vector<8xf32>
    %57 = vector.multi_reduction <add>, %56, %cst_31 [1] : vector<8x8xf32> to vector<8xf32>
    %58 = vector.shape_cast %57 : vector<8xf32> to vector<8x1xf32>
    %59 = tpu.reciprocal %58 {approx = true} : vector<8x1xf32> -> vector<8x1xf32>
    %60 = vector.broadcast %59 : vector<8x1xf32> to vector<8x8xf32>
    %61 = arith.mulf %56, %60 : vector<8x8xf32>
    %62 = arith.truncf %61 : vector<8x8xf32> to vector<8x8xbf16>
    %cst_32 = arith.constant dense<0.000000e+00> : vector<8x8xf32>
    %63 = tpu.matmul %62, %49, %cst_32 {dimension_numbers = #tpu.dot_dimension_numbers<[1], [0], [0], [1], [0, 0, 1, 1], [], []>} : vector<8x8xbf16>, vector<8x8xbf16>, vector<8x8xf32> -> vector<8x8xf32>
    %64 = vector.extract_strided_slice %21 {offsets = [0, 16], sizes = [8, 8], strides = [1, 1]} : vector<8x32xf32> to vector<8x8xf32>
    %65 = arith.truncf %64 : vector<8x8xf32> to vector<8x8xbf16>
    %66 = vector.extract_strided_slice %22 {offsets = [0, 16], sizes = [8, 8], strides = [1, 1]} : vector<8x32xf32> to vector<8x8xf32>
    %67 = arith.truncf %66 : vector<8x8xf32> to vector<8x8xbf16>
    %68 = vector.extract_strided_slice %23 {offsets = [0, 16], sizes = [8, 8], strides = [1, 1]} : vector<8x32xf32> to vector<8x8xf32>
    %69 = arith.truncf %68 : vector<8x8xf32> to vector<8x8xbf16>
    "tpu.trace_start"() <{level = 10 : i32, message = "te,se->ts"}> : () -> ()
    %cst_33 = arith.constant dense<0.000000e+00> : vector<8x8xf32>
    %70 = tpu.matmul %65, %67, %cst_33 {dimension_numbers = #tpu.dot_dimension_numbers<[1], [1], [0], [0], [0, 0, 1, 0], [], []>} : vector<8x8xbf16>, vector<8x8xbf16>, vector<8x8xf32> -> vector<8x8xf32>
    "tpu.trace_stop"() : () -> ()
    %71 = arith.addf %70, %4 : vector<8x8xf32>
    %cst_34 = arith.constant dense<0xFF800000> : vector<8xf32>
    %72 = vector.multi_reduction <maximumf>, %71, %cst_34 [1] : vector<8x8xf32> to vector<8xf32>
    %73 = vector.shape_cast %72 : vector<8xf32> to vector<8x1xf32>
    %74 = vector.broadcast %73 : vector<8x1xf32> to vector<8x8xf32>
    %75 = arith.subf %71, %74 : vector<8x8xf32>
    %76 = math.exp %75 : vector<8x8xf32>
    %cst_35 = arith.constant dense<0.000000e+00> : vector<8xf32>
    %77 = vector.multi_reduction <add>, %76, %cst_35 [1] : vector<8x8xf32> to vector<8xf32>
    %78 = vector.shape_cast %77 : vector<8xf32> to vector<8x1xf32>
    %79 = tpu.reciprocal %78 {approx = true} : vector<8x1xf32> -> vector<8x1xf32>
    %80 = vector.broadcast %79 : vector<8x1xf32> to vector<8x8xf32>
    %81 = arith.mulf %76, %80 : vector<8x8xf32>
    %82 = arith.truncf %81 : vector<8x8xf32> to vector<8x8xbf16>
    %cst_36 = arith.constant dense<0.000000e+00> : vector<8x8xf32>
    %83 = tpu.matmul %82, %69, %cst_36 {dimension_numbers = #tpu.dot_dimension_numbers<[1], [0], [0], [1], [0, 0, 1, 1], [], []>} : vector<8x8xbf16>, vector<8x8xbf16>, vector<8x8xf32> -> vector<8x8xf32>
    %84 = vector.extract_strided_slice %21 {offsets = [0, 24], sizes = [8, 8], strides = [1, 1]} : vector<8x32xf32> to vector<8x8xf32>
    %85 = arith.truncf %84 : vector<8x8xf32> to vector<8x8xbf16>
    %86 = vector.extract_strided_slice %22 {offsets = [0, 24], sizes = [8, 8], strides = [1, 1]} : vector<8x32xf32> to vector<8x8xf32>
    %87 = arith.truncf %86 : vector<8x8xf32> to vector<8x8xbf16>
    %88 = vector.extract_strided_slice %23 {offsets = [0, 24], sizes = [8, 8], strides = [1, 1]} : vector<8x32xf32> to vector<8x8xf32>
    %89 = arith.truncf %88 : vector<8x8xf32> to vector<8x8xbf16>
    "tpu.trace_start"() <{level = 10 : i32, message = "te,se->ts"}> : () -> ()
    %cst_37 = arith.constant dense<0.000000e+00> : vector<8x8xf32>
    %90 = tpu.matmul %85, %87, %cst_37 {dimension_numbers = #tpu.dot_dimension_numbers<[1], [1], [0], [0], [0, 0, 1, 0], [], []>} : vector<8x8xbf16>, vector<8x8xbf16>, vector<8x8xf32> -> vector<8x8xf32>
    "tpu.trace_stop"() : () -> ()
    %91 = arith.addf %90, %4 : vector<8x8xf32>
    %cst_38 = arith.constant dense<0xFF800000> : vector<8xf32>
    %92 = vector.multi_reduction <maximumf>, %91, %cst_38 [1] : vector<8x8xf32> to vector<8xf32>
    %93 = vector.shape_cast %92 : vector<8xf32> to vector<8x1xf32>
    %94 = vector.broadcast %93 : vector<8x1xf32> to vector<8x8xf32>
    %95 = arith.subf %91, %94 : vector<8x8xf32>
    %96 = math.exp %95 : vector<8x8xf32>
    %cst_39 = arith.constant dense<0.000000e+00> : vector<8xf32>
    %97 = vector.multi_reduction <add>, %96, %cst_39 [1] : vector<8x8xf32> to vector<8xf32>
    %98 = vector.shape_cast %97 : vector<8xf32> to vector<8x1xf32>
    %99 = tpu.reciprocal %98 {approx = true} : vector<8x1xf32> -> vector<8x1xf32>
    %100 = vector.broadcast %99 : vector<8x1xf32> to vector<8x8xf32>
    %101 = arith.mulf %96, %100 : vector<8x8xf32>
    %102 = arith.truncf %101 : vector<8x8xf32> to vector<8x8xbf16>
    %cst_40 = arith.constant dense<0.000000e+00> : vector<8x8xf32>
    %103 = tpu.matmul %102, %89, %cst_40 {dimension_numbers = #tpu.dot_dimension_numbers<[1], [0], [0], [1], [0, 0, 1, 1], [], []>} : vector<8x8xbf16>, vector<8x8xbf16>, vector<8x8xf32> -> vector<8x8xf32>
    %104 = tpu.concatenate %43, %63, %83, %103 in 1 : vector<8x8xf32>, vector<8x8xf32>, vector<8x8xf32>, vector<8x8xf32> -> vector<8x32xf32>
    %105 = arith.truncf %104 : vector<8x32xf32> to vector<8x32xbf16>
    %cst_41 = arith.constant dense<0.000000e+00> : vector<8x32xf32>
    %106 = tpu.matmul %105, %12, %cst_41 {dimension_numbers = #tpu.dot_dimension_numbers<[1], [0], [0], [1], [0, 0, 1, 1], [], []>} : vector<8x32xbf16>, vector<32x32xbf16>, vector<8x32xf32> -> vector<8x32xf32>
    %107 = arith.addf %106, %3 : vector<8x32xf32>
    %cst_42 = arith.constant dense<0.000000e+00> : vector<8xf32>
    %108 = vector.multi_reduction <add>, %107, %cst_42 [1] : vector<8x32xf32> to vector<8xf32>
    %109 = vector.shape_cast %108 : vector<8xf32> to vector<8x1xf32>
    %cst_43 = arith.constant 3.200000e+01 : f32
    %110 = vector.broadcast %cst_43 : f32 to vector<8x1xf32>
    %111 = arith.divf %109, %110 : vector<8x1xf32>
    %112 = vector.broadcast %111 : vector<8x1xf32> to vector<8x32xf32>
    %113 = arith.subf %107, %112 : vector<8x32xf32>
    %114 = arith.mulf %113, %113 : vector<8x32xf32>
    %cst_44 = arith.constant dense<0.000000e+00> : vector<8xf32>
    %115 = vector.multi_reduction <add>, %114, %cst_44 [1] : vector<8x32xf32> to vector<8xf32>
    %116 = vector.shape_cast %115 : vector<8xf32> to vector<8x1xf32>
    %cst_45 = arith.constant 3.200000e+01 : f32
    %117 = vector.broadcast %cst_45 : f32 to vector<8x1xf32>
    %118 = arith.divf %116, %117 : vector<8x1xf32>
    %119 = vector.broadcast %111 : vector<8x1xf32> to vector<8x32xf32>
    %120 = arith.subf %107, %119 : vector<8x32xf32>
    %cst_46 = arith.constant 9.99999997E-7 : f32
    %121 = vector.broadcast %cst_46 : f32 to vector<8x1xf32>
    %122 = arith.addf %118, %121 : vector<8x1xf32>
    %123 = math.rsqrt %122 : vector<8x1xf32>
    %124 = vector.broadcast %123 : vector<8x1xf32> to vector<8x32xf32>
    %125 = arith.mulf %120, %124 : vector<8x32xf32>
    %126 = vector.broadcast %14 : vector<1x32xf32> to vector<8x32xf32>
    %127 = arith.mulf %125, %126 : vector<8x32xf32>
    %128 = vector.broadcast %16 : vector<1x32xf32> to vector<8x32xf32>
    %129 = arith.addf %127, %128 : vector<8x32xf32>
    %c0_47 = arith.constant 0 : index
    %c0_48 = arith.constant 0 : index
    %c0_49 = arith.constant 0 : index
    %130 = vector.load %arg7[%c0_47, %c0_48, %c0_49] : memref<1x10x32xf32, #tpu.memory_space<vmem>>, vector<1x10x32xf32>
    %131 = vector.shape_cast %130 : vector<1x10x32xf32> to vector<10x32xf32>
    %c0_50 = arith.constant 0 : index
    %c0_51 = arith.constant 0 : index
    %132 = vector.load %arg29[%c0_50, %c0_51] : memref<1x10xf32, #tpu.memory_space<vmem>>, vector<1x10xf32>
    %c0_52 = arith.constant 0 : index
    %c0_53 = arith.constant 0 : index
    %c0_54 = arith.constant 0 : index
    %133 = vector.load %arg14[%c0_52, %c0_53, %c0_54] : memref<1x32x32xbf16, #tpu.memory_space<vmem>>, vector<1x32x32xbf16>
    %134 = vector.shape_cast %133 : vector<1x32x32xbf16> to vector<32x32xbf16>
    %c0_55 = arith.constant 0 : index
    %c0_56 = arith.constant 0 : index
    %c0_57 = arith.constant 0 : index
    %135 = vector.load %arg15[%c0_55, %c0_56, %c0_57] : memref<1x32x32xbf16, #tpu.memory_space<vmem>>, vector<1x32x32xbf16>
    %136 = vector.shape_cast %135 : vector<1x32x32xbf16> to vector<32x32xbf16>
    %c0_58 = arith.constant 0 : index
    %c0_59 = arith.constant 0 : index
    %c0_60 = arith.constant 0 : index
    %137 = vector.load %arg16[%c0_58, %c0_59, %c0_60] : memref<1x32x32xbf16, #tpu.memory_space<vmem>>, vector<1x32x32xbf16>
    %138 = vector.shape_cast %137 : vector<1x32x32xbf16> to vector<32x32xbf16>
    %c0_61 = arith.constant 0 : index
    %c0_62 = arith.constant 0 : index
    %c0_63 = arith.constant 0 : index
    %139 = vector.load %arg17[%c0_61, %c0_62, %c0_63] : memref<1x32x32xbf16, #tpu.memory_space<vmem>>, vector<1x32x32xbf16>
    %140 = vector.shape_cast %139 : vector<1x32x32xbf16> to vector<32x32xbf16>
    %c0_64 = arith.constant 0 : index
    %c0_65 = arith.constant 0 : index
    %c0_66 = arith.constant 0 : index
    %141 = vector.load %arg18[%c0_64, %c0_65, %c0_66] : memref<1x1x32xf32, #tpu.memory_space<vmem>>, vector<1x1x32xf32>
    %142 = vector.shape_cast %141 : vector<1x1x32xf32> to vector<1x32xf32>
    %c0_67 = arith.constant 0 : index
    %c0_68 = arith.constant 0 : index
    %c0_69 = arith.constant 0 : index
    %143 = vector.load %arg19[%c0_67, %c0_68, %c0_69] : memref<1x1x32xf32, #tpu.memory_space<vmem>>, vector<1x1x32xf32>
    %144 = vector.shape_cast %143 : vector<1x1x32xf32> to vector<1x32xf32>
    %145 = arith.truncf %129 : vector<8x32xf32> to vector<8x32xbf16>
    %146 = arith.truncf %131 : vector<10x32xf32> to vector<10x32xbf16>
    %cst_70 = arith.constant dense<0.000000e+00> : vector<8x32xf32>
    %147 = tpu.matmul %145, %134, %cst_70 {dimension_numbers = #tpu.dot_dimension_numbers<[1], [0], [0], [1], [0, 0, 1, 1], [], []>} : vector<8x32xbf16>, vector<32x32xbf16>, vector<8x32xf32> -> vector<8x32xf32>
    %cst_71 = arith.constant 0.353553385 : f32
    %148 = vector.broadcast %cst_71 : f32 to vector<8x32xf32>
    %149 = arith.mulf %147, %148 : vector<8x32xf32>
    %cst_72 = arith.constant dense<0.000000e+00> : vector<10x32xf32>
    %150 = tpu.matmul %146, %136, %cst_72 {dimension_numbers = #tpu.dot_dimension_numbers<[1], [0], [0], [1], [0, 0, 1, 1], [], []>} : vector<10x32xbf16>, vector<32x32xbf16>, vector<10x32xf32> -> vector<10x32xf32>
    %cst_73 = arith.constant dense<0.000000e+00> : vector<10x32xf32>
    %151 = tpu.matmul %146, %138, %cst_73 {dimension_numbers = #tpu.dot_dimension_numbers<[1], [0], [0], [1], [0, 0, 1, 1], [], []>} : vector<10x32xbf16>, vector<32x32xbf16>, vector<10x32xf32> -> vector<10x32xf32>
    %152 = vector.extract_strided_slice %149 {offsets = [0, 0], sizes = [8, 8], strides = [1, 1]} : vector<8x32xf32> to vector<8x8xf32>
    %153 = arith.truncf %152 : vector<8x8xf32> to vector<8x8xbf16>
    %154 = vector.extract_strided_slice %150 {offsets = [0, 0], sizes = [10, 8], strides = [1, 1]} : vector<10x32xf32> to vector<10x8xf32>
    %155 = arith.truncf %154 : vector<10x8xf32> to vector<10x8xbf16>
    %156 = vector.extract_strided_slice %151 {offsets = [0, 0], sizes = [10, 8], strides = [1, 1]} : vector<10x32xf32> to vector<10x8xf32>
    %157 = arith.truncf %156 : vector<10x8xf32> to vector<10x8xbf16>
    "tpu.trace_start"() <{level = 10 : i32, message = "te,se->ts"}> : () -> ()
    %cst_74 = arith.constant dense<0.000000e+00> : vector<8x10xf32>
    %158 = tpu.matmul %153, %155, %cst_74 {dimension_numbers = #tpu.dot_dimension_numbers<[1], [1], [0], [0], [0, 0, 1, 0], [], []>} : vector<8x8xbf16>, vector<10x8xbf16>, vector<8x10xf32> -> vector<8x10xf32>
    "tpu.trace_stop"() : () -> ()
    %159 = vector.broadcast %132 : vector<1x10xf32> to vector<8x10xf32>
    %160 = arith.addf %158, %159 : vector<8x10xf32>
    %cst_75 = arith.constant dense<0xFF800000> : vector<8xf32>
    %161 = vector.multi_reduction <maximumf>, %160, %cst_75 [1] : vector<8x10xf32> to vector<8xf32>
    %162 = vector.shape_cast %161 : vector<8xf32> to vector<8x1xf32>
    %163 = vector.broadcast %162 : vector<8x1xf32> to vector<8x10xf32>
    %164 = arith.subf %160, %163 : vector<8x10xf32>
    %165 = math.exp %164 : vector<8x10xf32>
    %cst_76 = arith.constant dense<0.000000e+00> : vector<8xf32>
    %166 = vector.multi_reduction <add>, %165, %cst_76 [1] : vector<8x10xf32> to vector<8xf32>
    %167 = vector.shape_cast %166 : vector<8xf32> to vector<8x1xf32>
    %168 = tpu.reciprocal %167 {approx = true} : vector<8x1xf32> -> vector<8x1xf32>
    %169 = vector.broadcast %168 : vector<8x1xf32> to vector<8x10xf32>
    %170 = arith.mulf %165, %169 : vector<8x10xf32>
    %171 = arith.truncf %170 : vector<8x10xf32> to vector<8x10xbf16>
    %cst_77 = arith.constant dense<0.000000e+00> : vector<8x8xf32>
    %172 = tpu.matmul %171, %157, %cst_77 {dimension_numbers = #tpu.dot_dimension_numbers<[1], [0], [0], [1], [0, 0, 1, 1], [], []>} : vector<8x10xbf16>, vector<10x8xbf16>, vector<8x8xf32> -> vector<8x8xf32>
    %173 = vector.extract_strided_slice %149 {offsets = [0, 8], sizes = [8, 8], strides = [1, 1]} : vector<8x32xf32> to vector<8x8xf32>
    %174 = arith.truncf %173 : vector<8x8xf32> to vector<8x8xbf16>
    %175 = vector.extract_strided_slice %150 {offsets = [0, 8], sizes = [10, 8], strides = [1, 1]} : vector<10x32xf32> to vector<10x8xf32>
    %176 = arith.truncf %175 : vector<10x8xf32> to vector<10x8xbf16>
    %177 = vector.extract_strided_slice %151 {offsets = [0, 8], sizes = [10, 8], strides = [1, 1]} : vector<10x32xf32> to vector<10x8xf32>
    %178 = arith.truncf %177 : vector<10x8xf32> to vector<10x8xbf16>
    "tpu.trace_start"() <{level = 10 : i32, message = "te,se->ts"}> : () -> ()
    %cst_78 = arith.constant dense<0.000000e+00> : vector<8x10xf32>
    %179 = tpu.matmul %174, %176, %cst_78 {dimension_numbers = #tpu.dot_dimension_numbers<[1], [1], [0], [0], [0, 0, 1, 0], [], []>} : vector<8x8xbf16>, vector<10x8xbf16>, vector<8x10xf32> -> vector<8x10xf32>
    "tpu.trace_stop"() : () -> ()
    %180 = vector.broadcast %132 : vector<1x10xf32> to vector<8x10xf32>
    %181 = arith.addf %179, %180 : vector<8x10xf32>
    %cst_79 = arith.constant dense<0xFF800000> : vector<8xf32>
    %182 = vector.multi_reduction <maximumf>, %181, %cst_79 [1] : vector<8x10xf32> to vector<8xf32>
    %183 = vector.shape_cast %182 : vector<8xf32> to vector<8x1xf32>
    %184 = vector.broadcast %183 : vector<8x1xf32> to vector<8x10xf32>
    %185 = arith.subf %181, %184 : vector<8x10xf32>
    %186 = math.exp %185 : vector<8x10xf32>
    %cst_80 = arith.constant dense<0.000000e+00> : vector<8xf32>
    %187 = vector.multi_reduction <add>, %186, %cst_80 [1] : vector<8x10xf32> to vector<8xf32>
    %188 = vector.shape_cast %187 : vector<8xf32> to vector<8x1xf32>
    %189 = tpu.reciprocal %188 {approx = true} : vector<8x1xf32> -> vector<8x1xf32>
    %190 = vector.broadcast %189 : vector<8x1xf32> to vector<8x10xf32>
    %191 = arith.mulf %186, %190 : vector<8x10xf32>
    %192 = arith.truncf %191 : vector<8x10xf32> to vector<8x10xbf16>
    %cst_81 = arith.constant dense<0.000000e+00> : vector<8x8xf32>
    %193 = tpu.matmul %192, %178, %cst_81 {dimension_numbers = #tpu.dot_dimension_numbers<[1], [0], [0], [1], [0, 0, 1, 1], [], []>} : vector<8x10xbf16>, vector<10x8xbf16>, vector<8x8xf32> -> vector<8x8xf32>
    %194 = vector.extract_strided_slice %149 {offsets = [0, 16], sizes = [8, 8], strides = [1, 1]} : vector<8x32xf32> to vector<8x8xf32>
    %195 = arith.truncf %194 : vector<8x8xf32> to vector<8x8xbf16>
    %196 = vector.extract_strided_slice %150 {offsets = [0, 16], sizes = [10, 8], strides = [1, 1]} : vector<10x32xf32> to vector<10x8xf32>
    %197 = arith.truncf %196 : vector<10x8xf32> to vector<10x8xbf16>
    %198 = vector.extract_strided_slice %151 {offsets = [0, 16], sizes = [10, 8], strides = [1, 1]} : vector<10x32xf32> to vector<10x8xf32>
    %199 = arith.truncf %198 : vector<10x8xf32> to vector<10x8xbf16>
    "tpu.trace_start"() <{level = 10 : i32, message = "te,se->ts"}> : () -> ()
    %cst_82 = arith.constant dense<0.000000e+00> : vector<8x10xf32>
    %200 = tpu.matmul %195, %197, %cst_82 {dimension_numbers = #tpu.dot_dimension_numbers<[1], [1], [0], [0], [0, 0, 1, 0], [], []>} : vector<8x8xbf16>, vector<10x8xbf16>, vector<8x10xf32> -> vector<8x10xf32>
    "tpu.trace_stop"() : () -> ()
    %201 = vector.broadcast %132 : vector<1x10xf32> to vector<8x10xf32>
    %202 = arith.addf %200, %201 : vector<8x10xf32>
    %cst_83 = arith.constant dense<0xFF800000> : vector<8xf32>
    %203 = vector.multi_reduction <maximumf>, %202, %cst_83 [1] : vector<8x10xf32> to vector<8xf32>
    %204 = vector.shape_cast %203 : vector<8xf32> to vector<8x1xf32>
    %205 = vector.broadcast %204 : vector<8x1xf32> to vector<8x10xf32>
    %206 = arith.subf %202, %205 : vector<8x10xf32>
    %207 = math.exp %206 : vector<8x10xf32>
    %cst_84 = arith.constant dense<0.000000e+00> : vector<8xf32>
    %208 = vector.multi_reduction <add>, %207, %cst_84 [1] : vector<8x10xf32> to vector<8xf32>
    %209 = vector.shape_cast %208 : vector<8xf32> to vector<8x1xf32>
    %210 = tpu.reciprocal %209 {approx = true} : vector<8x1xf32> -> vector<8x1xf32>
    %211 = vector.broadcast %210 : vector<8x1xf32> to vector<8x10xf32>
    %212 = arith.mulf %207, %211 : vector<8x10xf32>
    %213 = arith.truncf %212 : vector<8x10xf32> to vector<8x10xbf16>
    %cst_85 = arith.constant dense<0.000000e+00> : vector<8x8xf32>
    %214 = tpu.matmul %213, %199, %cst_85 {dimension_numbers = #tpu.dot_dimension_numbers<[1], [0], [0], [1], [0, 0, 1, 1], [], []>} : vector<8x10xbf16>, vector<10x8xbf16>, vector<8x8xf32> -> vector<8x8xf32>
    %215 = vector.extract_strided_slice %149 {offsets = [0, 24], sizes = [8, 8], strides = [1, 1]} : vector<8x32xf32> to vector<8x8xf32>
    %216 = arith.truncf %215 : vector<8x8xf32> to vector<8x8xbf16>
    %217 = vector.extract_strided_slice %150 {offsets = [0, 24], sizes = [10, 8], strides = [1, 1]} : vector<10x32xf32> to vector<10x8xf32>
    %218 = arith.truncf %217 : vector<10x8xf32> to vector<10x8xbf16>
    %219 = vector.extract_strided_slice %151 {offsets = [0, 24], sizes = [10, 8], strides = [1, 1]} : vector<10x32xf32> to vector<10x8xf32>
    %220 = arith.truncf %219 : vector<10x8xf32> to vector<10x8xbf16>
    "tpu.trace_start"() <{level = 10 : i32, message = "te,se->ts"}> : () -> ()
    %cst_86 = arith.constant dense<0.000000e+00> : vector<8x10xf32>
    %221 = tpu.matmul %216, %218, %cst_86 {dimension_numbers = #tpu.dot_dimension_numbers<[1], [1], [0], [0], [0, 0, 1, 0], [], []>} : vector<8x8xbf16>, vector<10x8xbf16>, vector<8x10xf32> -> vector<8x10xf32>
    "tpu.trace_stop"() : () -> ()
    %222 = vector.broadcast %132 : vector<1x10xf32> to vector<8x10xf32>
    %223 = arith.addf %221, %222 : vector<8x10xf32>
    %cst_87 = arith.constant dense<0xFF800000> : vector<8xf32>
    %224 = vector.multi_reduction <maximumf>, %223, %cst_87 [1] : vector<8x10xf32> to vector<8xf32>
    %225 = vector.shape_cast %224 : vector<8xf32> to vector<8x1xf32>
    %226 = vector.broadcast %225 : vector<8x1xf32> to vector<8x10xf32>
    %227 = arith.subf %223, %226 : vector<8x10xf32>
    %228 = math.exp %227 : vector<8x10xf32>
    %cst_88 = arith.constant dense<0.000000e+00> : vector<8xf32>
    %229 = vector.multi_reduction <add>, %228, %cst_88 [1] : vector<8x10xf32> to vector<8xf32>
    %230 = vector.shape_cast %229 : vector<8xf32> to vector<8x1xf32>
    %231 = tpu.reciprocal %230 {approx = true} : vector<8x1xf32> -> vector<8x1xf32>
    %232 = vector.broadcast %231 : vector<8x1xf32> to vector<8x10xf32>
    %233 = arith.mulf %228, %232 : vector<8x10xf32>
    %234 = arith.truncf %233 : vector<8x10xf32> to vector<8x10xbf16>
    %cst_89 = arith.constant dense<0.000000e+00> : vector<8x8xf32>
    %235 = tpu.matmul %234, %220, %cst_89 {dimension_numbers = #tpu.dot_dimension_numbers<[1], [0], [0], [1], [0, 0, 1, 1], [], []>} : vector<8x10xbf16>, vector<10x8xbf16>, vector<8x8xf32> -> vector<8x8xf32>
    %236 = tpu.concatenate %172, %193, %214, %235 in 1 : vector<8x8xf32>, vector<8x8xf32>, vector<8x8xf32>, vector<8x8xf32> -> vector<8x32xf32>
    %237 = arith.truncf %236 : vector<8x32xf32> to vector<8x32xbf16>
    %cst_90 = arith.constant dense<0.000000e+00> : vector<8x32xf32>
    %238 = tpu.matmul %237, %140, %cst_90 {dimension_numbers = #tpu.dot_dimension_numbers<[1], [0], [0], [1], [0, 0, 1, 1], [], []>} : vector<8x32xbf16>, vector<32x32xbf16>, vector<8x32xf32> -> vector<8x32xf32>
    %239 = arith.addf %238, %129 : vector<8x32xf32>
    %cst_91 = arith.constant dense<0.000000e+00> : vector<8xf32>
    %240 = vector.multi_reduction <add>, %239, %cst_91 [1] : vector<8x32xf32> to vector<8xf32>
    %241 = vector.shape_cast %240 : vector<8xf32> to vector<8x1xf32>
    %cst_92 = arith.constant 3.200000e+01 : f32
    %242 = vector.broadcast %cst_92 : f32 to vector<8x1xf32>
    %243 = arith.divf %241, %242 : vector<8x1xf32>
    %244 = vector.broadcast %243 : vector<8x1xf32> to vector<8x32xf32>
    %245 = arith.subf %239, %244 : vector<8x32xf32>
    %246 = arith.mulf %245, %245 : vector<8x32xf32>
    %cst_93 = arith.constant dense<0.000000e+00> : vector<8xf32>
    %247 = vector.multi_reduction <add>, %246, %cst_93 [1] : vector<8x32xf32> to vector<8xf32>
    %248 = vector.shape_cast %247 : vector<8xf32> to vector<8x1xf32>
    %cst_94 = arith.constant 3.200000e+01 : f32
    %249 = vector.broadcast %cst_94 : f32 to vector<8x1xf32>
    %250 = arith.divf %248, %249 : vector<8x1xf32>
    %251 = vector.broadcast %243 : vector<8x1xf32> to vector<8x32xf32>
    %252 = arith.subf %239, %251 : vector<8x32xf32>
    %cst_95 = arith.constant 9.99999997E-7 : f32
    %253 = vector.broadcast %cst_95 : f32 to vector<8x1xf32>
    %254 = arith.addf %250, %253 : vector<8x1xf32>
    %255 = math.rsqrt %254 : vector<8x1xf32>
    %256 = vector.broadcast %255 : vector<8x1xf32> to vector<8x32xf32>
    %257 = arith.mulf %252, %256 : vector<8x32xf32>
    %258 = vector.broadcast %142 : vector<1x32xf32> to vector<8x32xf32>
    %259 = arith.mulf %257, %258 : vector<8x32xf32>
    %260 = vector.broadcast %144 : vector<1x32xf32> to vector<8x32xf32>
    %261 = arith.addf %259, %260 : vector<8x32xf32>
    %262 = arith.truncf %261 : vector<8x32xf32> to vector<8x32xbf16>
    %c0_96 = arith.constant 0 : index
    %c0_97 = arith.constant 0 : index
    %c0_98 = arith.constant 0 : index
    %263 = vector.load %arg20[%c0_96, %c0_97, %c0_98] : memref<1x32x64xbf16, #tpu.memory_space<vmem>>, vector<1x32x64xbf16>
    %264 = vector.shape_cast %263 : vector<1x32x64xbf16> to vector<32x64xbf16>
    %cst_99 = arith.constant dense<0.000000e+00> : vector<8x64xf32>
    %265 = tpu.matmul %262, %264, %cst_99 {dimension_numbers = #tpu.dot_dimension_numbers<[1], [0], [0], [1], [0, 0, 1, 1], [], []>} : vector<8x32xbf16>, vector<32x64xbf16>, vector<8x64xf32> -> vector<8x64xf32>
    %c0_100 = arith.constant 0 : index
    %c0_101 = arith.constant 0 : index
    %c0_102 = arith.constant 0 : index
    %266 = vector.load %arg21[%c0_100, %c0_101, %c0_102] : memref<1x1x64xf32, #tpu.memory_space<vmem>>, vector<1x1x64xf32>
    %267 = vector.shape_cast %266 : vector<1x1x64xf32> to vector<1x64xf32>
    %268 = vector.broadcast %267 : vector<1x64xf32> to vector<8x64xf32>
    %269 = arith.addf %265, %268 : vector<8x64xf32>
    %cst_103 = arith.constant 0.000000e+00 : f32
    %270 = vector.broadcast %cst_103 : f32 to vector<8x64xf32>
    %271 = arith.maximumf %269, %270 : vector<8x64xf32>
    %272 = arith.truncf %271 : vector<8x64xf32> to vector<8x64xbf16>
    %c0_104 = arith.constant 0 : index
    %c0_105 = arith.constant 0 : index
    %c0_106 = arith.constant 0 : index
    %273 = vector.load %arg22[%c0_104, %c0_105, %c0_106] : memref<1x64x32xbf16, #tpu.memory_space<vmem>>, vector<1x64x32xbf16>
    %274 = vector.shape_cast %273 : vector<1x64x32xbf16> to vector<64x32xbf16>
    %cst_107 = arith.constant dense<0.000000e+00> : vector<8x32xf32>
    %275 = tpu.matmul %272, %274, %cst_107 {dimension_numbers = #tpu.dot_dimension_numbers<[1], [0], [0], [1], [0, 0, 1, 1], [], []>} : vector<8x64xbf16>, vector<64x32xbf16>, vector<8x32xf32> -> vector<8x32xf32>
    %c0_108 = arith.constant 0 : index
    %c0_109 = arith.constant 0 : index
    %c0_110 = arith.constant 0 : index
    %276 = vector.load %arg23[%c0_108, %c0_109, %c0_110] : memref<1x1x32xf32, #tpu.memory_space<vmem>>, vector<1x1x32xf32>
    %277 = vector.shape_cast %276 : vector<1x1x32xf32> to vector<1x32xf32>
    %278 = vector.broadcast %277 : vector<1x32xf32> to vector<8x32xf32>
    %279 = arith.addf %275, %278 : vector<8x32xf32>
    %280 = arith.addf %279, %261 : vector<8x32xf32>
    %c0_111 = arith.constant 0 : index
    %c0_112 = arith.constant 0 : index
    %c0_113 = arith.constant 0 : index
    %281 = vector.load %arg24[%c0_111, %c0_112, %c0_113] : memref<1x1x32xf32, #tpu.memory_space<vmem>>, vector<1x1x32xf32>
    %282 = vector.shape_cast %281 : vector<1x1x32xf32> to vector<1x32xf32>
    %c0_114 = arith.constant 0 : index
    %c0_115 = arith.constant 0 : index
    %c0_116 = arith.constant 0 : index
    %283 = vector.load %arg25[%c0_114, %c0_115, %c0_116] : memref<1x1x32xf32, #tpu.memory_space<vmem>>, vector<1x1x32xf32>
    %284 = vector.shape_cast %283 : vector<1x1x32xf32> to vector<1x32xf32>
    %cst_117 = arith.constant dense<0.000000e+00> : vector<8xf32>
    %285 = vector.multi_reduction <add>, %280, %cst_117 [1] : vector<8x32xf32> to vector<8xf32>
    %286 = vector.shape_cast %285 : vector<8xf32> to vector<8x1xf32>
    %cst_118 = arith.constant 3.200000e+01 : f32
    %287 = vector.broadcast %cst_118 : f32 to vector<8x1xf32>
    %288 = arith.divf %286, %287 : vector<8x1xf32>
    %289 = vector.broadcast %288 : vector<8x1xf32> to vector<8x32xf32>
    %290 = arith.subf %280, %289 : vector<8x32xf32>
    %291 = arith.mulf %290, %290 : vector<8x32xf32>
    %cst_119 = arith.constant dense<0.000000e+00> : vector<8xf32>
    %292 = vector.multi_reduction <add>, %291, %cst_119 [1] : vector<8x32xf32> to vector<8xf32>
    %293 = vector.shape_cast %292 : vector<8xf32> to vector<8x1xf32>
    %cst_120 = arith.constant 3.200000e+01 : f32
    %294 = vector.broadcast %cst_120 : f32 to vector<8x1xf32>
    %295 = arith.divf %293, %294 : vector<8x1xf32>
    %296 = vector.broadcast %288 : vector<8x1xf32> to vector<8x32xf32>
    %297 = arith.subf %280, %296 : vector<8x32xf32>
    %cst_121 = arith.constant 9.99999997E-7 : f32
    %298 = vector.broadcast %cst_121 : f32 to vector<8x1xf32>
    %299 = arith.addf %295, %298 : vector<8x1xf32>
    %300 = math.rsqrt %299 : vector<8x1xf32>
    %301 = vector.broadcast %300 : vector<8x1xf32> to vector<8x32xf32>
    %302 = arith.mulf %297, %301 : vector<8x32xf32>
    %303 = vector.broadcast %282 : vector<1x32xf32> to vector<8x32xf32>
    %304 = arith.mulf %302, %303 : vector<8x32xf32>
    %305 = vector.broadcast %284 : vector<1x32xf32> to vector<8x32xf32>
    %306 = arith.addf %304, %305 : vector<8x32xf32>
    %c0_122 = arith.constant 0 : index
    %c0_123 = arith.constant 0 : index
    %307 = vector.load %arg27[%c0_122, %c0_123] : memref<8x32xf32, #tpu.memory_space<vmem>>, vector<8x32xf32>
    tpu.vector_store %arg27[%c0_122, %c0_123], %306 {strides = array<i32>} : memref<8x32xf32, #tpu.memory_space<vmem>>, vector<8x32xf32>,
    %c1_i32 = arith.constant 1 : i32
    %308 = arith.cmpi eq, %arg1, %c1_i32 : i32
    %309 = arith.extui %308 : i1 to i32
    %c0_i32_124 = arith.constant 0 : i32
    %310 = arith.cmpi ne, %309, %c0_i32_124 : i32
    scf.if %310 {
      %c0_125 = arith.constant 0 : index
      %c0_126 = arith.constant 0 : index
      %c0_127 = arith.constant 0 : index
      %311 = vector.load %arg26[%c0_125, %c0_126, %c0_127] : memref<1x8x32xf32, #tpu.memory_space<vmem>>, vector<1x8x32xf32>
      %312 = vector.shape_cast %311 : vector<1x8x32xf32> to vector<8x32xf32>
      %313 = vector.shape_cast %306 : vector<8x32xf32> to vector<1x8x32xf32>
      tpu.vector_store %arg26[%c0_125, %c0_126, %c0_127], %313 {strides = array<i32>} : memref<1x8x32xf32, #tpu.memory_space<vmem>>, vector<1x8x32xf32>,
    } else {
    }
    return
  }
  func.func @transform_0(%arg0: i32, %arg1: i32) -> (i32, i32, i32) {
    %c0_i32 = arith.constant 0 : i32
    %c0_i32_0 = arith.constant 0 : i32
    %c0_i32_1 = arith.constant 0 : i32
    return %arg0, %c0_i32, %c0_i32_0 : i32, i32, i32
  }
  func.func @transform_1(%arg0: i32, %arg1: i32) -> (i32, i32) {
    %c0_i32 = arith.constant 0 : i32
    %c0_i32_0 = arith.constant 0 : i32
    %c0_i32_1 = arith.constant 0 : i32
    return %c0_i32, %c0_i32_0 : i32, i32
  }
  func.func @transform_2(%arg0: i32, %arg1: i32) -> (i32, i32) {
    %c0_i32 = arith.constant 0 : i32
    %c0_i32_0 = arith.constant 0 : i32
    %c0_i32_1 = arith.constant 0 : i32
    return %c0_i32, %c0_i32_0 : i32, i32
  }
  func.func @transform_3(%arg0: i32, %arg1: i32) -> (i32, i32, i32) {
    %c0_i32 = arith.constant 0 : i32
    %c0_i32_0 = arith.constant 0 : i32
    %c0_i32_1 = arith.constant 0 : i32
    return %arg0, %c0_i32, %c0_i32_0 : i32, i32, i32
  }
  func.func @transform_4(%arg0: i32, %arg1: i32) -> (i32, i32, i32) {
    %c0_i32 = arith.constant 0 : i32
    %c0_i32_0 = arith.constant 0 : i32
    %c0_i32_1 = arith.constant 0 : i32
    return %arg0, %c0_i32, %c0_i32_0 : i32, i32, i32
  }
  func.func @transform_5(%arg0: i32, %arg1: i32) -> (i32, i32, i32) {
    %c0_i32 = arith.constant 0 : i32
    %c0_i32_0 = arith.constant 0 : i32
    %c0_i32_1 = arith.constant 0 : i32
    return %arg0, %c0_i32, %c0_i32_0 : i32, i32, i32
  }
  func.func @transform_6(%arg0: i32, %arg1: i32) -> (i32, i32, i32) {
    %c0_i32 = arith.constant 0 : i32
    %c0_i32_0 = arith.constant 0 : i32
    %c0_i32_1 = arith.constant 0 : i32
    return %arg1, %c0_i32, %c0_i32_0 : i32, i32, i32
  }
  func.func @transform_7(%arg0: i32, %arg1: i32) -> (i32, i32, i32) {
    %c0_i32 = arith.constant 0 : i32
    %c0_i32_0 = arith.constant 0 : i32
    %c0_i32_1 = arith.constant 0 : i32
    return %arg1, %c0_i32, %c0_i32_0 : i32, i32, i32
  }
  func.func @transform_8(%arg0: i32, %arg1: i32) -> (i32, i32, i32) {
    %c0_i32 = arith.constant 0 : i32
    %c0_i32_0 = arith.constant 0 : i32
    %c0_i32_1 = arith.constant 0 : i32
    return %arg1, %c0_i32, %c0_i32_0 : i32, i32, i32
  }
  func.func @transform_9(%arg0: i32, %arg1: i32) -> (i32, i32, i32) {
    %c0_i32 = arith.constant 0 : i32
    %c0_i32_0 = arith.constant 0 : i32
    %c0_i32_1 = arith.constant 0 : i32
    return %arg1, %c0_i32, %c0_i32_0 : i32, i32, i32
  }
  func.func @transform_10(%arg0: i32, %arg1: i32) -> (i32, i32, i32) {
    %c0_i32 = arith.constant 0 : i32
    %c0_i32_0 = arith.constant 0 : i32
    %c0_i32_1 = arith.constant 0 : i32
    return %arg1, %c0_i32, %c0_i32_0 : i32, i32, i32
  }
  func.func @transform_11(%arg0: i32, %arg1: i32) -> (i32, i32, i32) {
    %c0_i32 = arith.constant 0 : i32
    %c0_i32_0 = arith.constant 0 : i32
    %c0_i32_1 = arith.constant 0 : i32
    return %arg1, %c0_i32, %c0_i32_0 : i32, i32, i32
  }
  func.func @transform_12(%arg0: i32, %arg1: i32) -> (i32, i32, i32) {
    %c0_i32 = arith.constant 0 : i32
    %c0_i32_0 = arith.constant 0 : i32
    %c0_i32_1 = arith.constant 0 : i32
    return %arg1, %c0_i32, %c0_i32_0 : i32, i32, i32
  }
  func.func @transform_13(%arg0: i32, %arg1: i32) -> (i32, i32, i32) {
    %c0_i32 = arith.constant 0 : i32
    %c0_i32_0 = arith.constant 0 : i32
    %c0_i32_1 = arith.constant 0 : i32
    return %arg1, %c0_i32, %c0_i32_0 : i32, i32, i32
  }
  func.func @transform_14(%arg0: i32, %arg1: i32) -> (i32, i32, i32) {
    %c0_i32 = arith.constant 0 : i32
    %c0_i32_0 = arith.constant 0 : i32
    %c0_i32_1 = arith.constant 0 : i32
    return %arg1, %c0_i32, %c0_i32_0 : i32, i32, i32
  }
  func.func @transform_15(%arg0: i32, %arg1: i32) -> (i32, i32, i32) {
    %c0_i32 = arith.constant 0 : i32
    %c0_i32_0 = arith.constant 0 : i32
    %c0_i32_1 = arith.constant 0 : i32
    return %arg1, %c0_i32, %c0_i32_0 : i32, i32, i32
  }
  func.func @transform_16(%arg0: i32, %arg1: i32) -> (i32, i32, i32) {
    %c0_i32 = arith.constant 0 : i32
    %c0_i32_0 = arith.constant 0 : i32
    %c0_i32_1 = arith.constant 0 : i32
    return %arg1, %c0_i32, %c0_i32_0 : i32, i32, i32
  }
  func.func @transform_17(%arg0: i32, %arg1: i32) -> (i32, i32, i32) {
    %c0_i32 = arith.constant 0 : i32
    %c0_i32_0 = arith.constant 0 : i32
    %c0_i32_1 = arith.constant 0 : i32
    return %arg1, %c0_i32, %c0_i32_0 : i32, i32, i32
  }
  func.func @transform_18(%arg0: i32, %arg1: i32) -> (i32, i32, i32) {
    %c0_i32 = arith.constant 0 : i32
    %c0_i32_0 = arith.constant 0 : i32
    %c0_i32_1 = arith.constant 0 : i32
    return %arg1, %c0_i32, %c0_i32_0 : i32, i32, i32
  }
  func.func @transform_19(%arg0: i32, %arg1: i32) -> (i32, i32, i32) {
    %c0_i32 = arith.constant 0 : i32
    %c0_i32_0 = arith.constant 0 : i32
    %c0_i32_1 = arith.constant 0 : i32
    return %arg1, %c0_i32, %c0_i32_0 : i32, i32, i32
  }
  func.func @transform_20(%arg0: i32, %arg1: i32) -> (i32, i32, i32) {
    %c0_i32 = arith.constant 0 : i32
    %c0_i32_0 = arith.constant 0 : i32
    %c0_i32_1 = arith.constant 0 : i32
    return %arg1, %c0_i32, %c0_i32_0 : i32, i32, i32
  }
  func.func @transform_21(%arg0: i32, %arg1: i32) -> (i32, i32, i32) {
    %c0_i32 = arith.constant 0 : i32
    %c0_i32_0 = arith.constant 0 : i32
    %c0_i32_1 = arith.constant 0 : i32
    return %arg1, %c0_i32, %c0_i32_0 : i32, i32, i32
  }
  func.func @transform_22(%arg0: i32, %arg1: i32) -> (i32, i32, i32) {
    %c0_i32 = arith.constant 0 : i32
    %c0_i32_0 = arith.constant 0 : i32
    %c0_i32_1 = arith.constant 0 : i32
    return %arg1, %c0_i32, %c0_i32_0 : i32, i32, i32
  }
  func.func @transform_23(%arg0: i32, %arg1: i32) -> (i32, i32, i32) {
    %c0_i32 = arith.constant 0 : i32
    %c0_i32_0 = arith.constant 0 : i32
    %c0_i32_1 = arith.constant 0 : i32
    return %arg1, %c0_i32, %c0_i32_0 : i32, i32, i32
  }
  func.func @transform_24(%arg0: i32, %arg1: i32) -> (i32, i32, i32) {
    %c0_i32 = arith.constant 0 : i32
    %c0_i32_0 = arith.constant 0 : i32
    %c0_i32_1 = arith.constant 0 : i32
    return %arg0, %c0_i32, %c0_i32_0 : i32, i32, i32
  }
}

</mosaic_0001>

<bundles_post_ra>
// kernel: tpu_custom_call.1
= control target key start
LH: loop header
LB: loop body
LE: loop exit
PB: predicated region body
PF: predicated region fallthrough
CT: control target
= control target key end

     0   :  { %s4419_s0 = inlined_call_operand.hbm [shape: f32[2,8,32], index: 0, kind: input, shape index: {}]   ;;  %s4420_s1 = inlined_call_operand.vmem [shape: f32[1,32], index: 1, kind: input, shape index: {}]   ;;  %s4421_s2 = inlined_call_operand.hbm [shape: f32[1,32], index: 2, kind: input, shape index: {}]   ;;  %s4422_s3 = inlined_call_operand.hbm [shape: f32[2,1,8], index: 3, kind: input, shape index: {}]   ;;  %s4423_s4 = inlined_call_operand.hbm [shape: f32[2,1,10], index: 4, kind: input, shape index: {}]   ;;  %s4424_s5 = inlined_call_operand.vmem [shape: f32[2,10,32], index: 5, kind: input, shape index: {}]   ;;  %s4425_s6 = inlined_call_operand.vmem [shape: bf16[2,32,32], index: 6, kind: input, shape index: {}]   ;;  %s4426_s7 = inlined_call_operand.vmem [shape: bf16[2,32,32], index: 7, kind: input, shape index: {}]   ;;  %s4427_s8 = inlined_call_operand.vmem [shape: bf16[2,32,32], index: 8, kind: input, shape index: {}]   ;;  %s4428_s9 = inlined_call_operand.vmem [shape: bf16[2,32,32], index: 9, kind: input, shape index: {}]   ;;  %s4429_s10 = inlined_call_operand.hbm [shape: f32[2,1,32], index: 10, kind: input, shape index: {}]   ;;  %s4430_s11 = inlined_call_operand.hbm [shape: f32[2,1,32], index: 11, kind: input, shape index: {}]   ;;  %s4431_s12 = inlined_call_operand.hbm [shape: bf16[2,32,32], index: 12, kind: input, shape index: {}]   ;;  %s4432_s13 = inlined_call_operand.hbm [shape: bf16[2,32,32], index: 13, kind: input, shape index: {}]   ;;  %s4433_s14 = inlined_call_operand.vmem [shape: bf16[2,32,32], index: 14, kind: input, shape index: {}]   ;;  %s4434_s15 = inlined_call_operand.hbm [shape: bf16[2,32,32], index: 15, kind: input, shape index: {}]   ;;  %s4435_s16 = inlined_call_operand.vmem [shape: f32[2,1,32], index: 16, kind: input, shape index: {}]   ;;  %s4436_s17 = inlined_call_operand.hbm [shape: f32[2,1,32], index: 17, kind: input, shape index: {}]   ;;  %s4437_s18 = inlined_call_operand.hbm [shape: bf16[2,32,64], index: 18, kind: input, shape index: {}]   ;;  %s4438_s19 = inlined_call_operand.vmem [shape: f32[2,1,64], index: 19, kind: input, shape index: {}]   ;;  %s4439_s20 = inlined_call_operand.vmem [shape: bf16[2,64,32], index: 20, kind: input, shape index: {}]   ;;  %s4440_s21 = inlined_call_operand.vmem [shape: f32[2,1,32], index: 21, kind: input, shape index: {}]   ;;  %s4441_s22 = inlined_call_operand.vmem [shape: f32[2,1,32], index: 22, kind: input, shape index: {}]   ;;  %s4442_s23 = inlined_call_operand.hbm [shape: f32[2,1,32], index: 23, kind: input, shape index: {}]   ;;  %s4443_s24 = inlined_call_operand.hbm [shape: f32[2,8,32], index: 24, kind: output, shape index: {}]  }
   0x1   :  { %4467 = sst [smem:[#allocation45_spill]] %s4419_s0 }
   0x2   :  { %4468 = sst [smem:[#allocation46_spill]] %s4420_s1 }
   0x3   :  { %4469 = sst [smem:[#allocation47_spill]] %s4421_s2 }
   0x4   :  { %4470 = sst [smem:[#allocation48_spill]] %s4422_s3 }
   0x5   :  { %4471 = sst [smem:[#allocation49_spill]] %s4423_s4 }
   0x6   :  { %4472 = sst [smem:[#allocation50_spill]] %s4424_s5 }
   0x7   :  { %4473 = sst [smem:[#allocation51_spill]] %s4425_s6 }
   0x8   :  { %4474 = sst [smem:[#allocation52_spill]] %s4426_s7 }
   0x9   :  { %4475 = sst [smem:[#allocation53_spill]] %s4427_s8 }
   0xa   :  { %4476 = sst [smem:[#allocation54_spill]] %s4428_s9 }
   0xb   :  { %4477 = sst [smem:[#allocation55_spill]] %s4429_s10 }
   0xc   :  { %4478 = sst [smem:[#allocation56_spill]] %s4430_s11 }
   0xd   :  { %4479 = sst [smem:[#allocation57_spill]] %s4431_s12 }
   0xe   :  { %4480 = sst [smem:[#allocation58_spill]] %s4432_s13 }
   0xf   :  { %4481 = sst [smem:[#allocation59_spill]] %s4433_s14 }
  0x10   :  { %4482 = sst [smem:[#allocation60_spill]] %s4434_s15 }
  0x11   :  { %4483 = sst [smem:[#allocation61_spill]] %s4435_s16 }
  0x12   :  { %4484 = sst [smem:[#allocation62_spill]] %s4436_s17 }
  0x13   :  { %4485 = sst [smem:[#allocation63_spill]] %s4437_s18 }
  0x14   :  { %4486 = sst [smem:[#allocation64_spill]] %s4438_s19 }
  0x15   :  { %4487 = sst [smem:[#allocation65_spill]] %s4439_s20 }
  0x16   :  { %4488 = sst [smem:[#allocation66_spill]] %s4440_s21 }
  0x17   :  { %4489 = sst [smem:[#allocation67_spill]] %s4441_s22 }
  0x18   :  { %4490 = sst [smem:[#allocation68_spill]] %s4442_s23 }
  0x19   :  { %4491 = sst [smem:[#allocation69_spill]] %s4443_s24 }
  0x1a   :  { %29 = vsyncpa [#allocation6], 0 }
  0x1b   :  { %31 = vsyncpa [#allocation6 + $0x1], 0 }
  0x1c   :  { %32 = vsyncpa [#allocation9], 0 }
  0x1d   :  { %33 = vsyncpa [#allocation7], 0 }
  0x1e   :  { %35 = vsyncpa [#allocation7 + $0x1], 0  ;;  %s3804_s5 = smov 0   ;;  %s3806_s26 = smov 0  }
  0x1f   :  { %s3808_s27 = smov 0   ;;  %s3810_s28 = smov 0  }
  0x20   :  { %s3812_s6 = smov 0   ;;  %s3814_s2 = smov 0  }
  0x21   :  { %s3816_s29 = smov 0   ;;  %s3818_s0 = smov 0  }
  0x22   :  { %s3820_s7 = smov 0   ;;  %s3822_s30 = smov 0  }
  0x23   :  { %s3824_s3 = smov 0  }
  0x24 LB: > { %4492 = sst [smem:[#allocation26_spill]] %s3628_s26  ;;  %s2747_s25 = sadd.s32 4294967294, %s3664_s3   ;;  %s3664_s3 = sphi %s3824_s3, %s41_s3   ;;  %s3660_s30 = sphi %s3822_s30, %s4578_s30   ;;  %s3656_s7 = sphi %s3820_s7, %s4577_s7   ;;  %s3652_s0 = sphi %s3818_s0, %s4576_s0   ;;  %s3648_s29 = sphi %s3816_s29, %s4575_s29   ;;  %s3644_s2 = sphi %s3814_s2, %s4574_s2   ;;  %s3640_s6 = sphi %s3812_s6, %s4573_s6   ;;  %s3636_s28 = sphi %s3810_s28, %s4572_s28   ;;  %s3632_s27 = sphi %s3808_s27, %s4571_s27   ;;  %s3628_s26 = sphi %s3806_s26, %s4570_s26   ;;  %s3624_s5 = sphi %s3804_s5, %s4569_s5  }
  0x25   : > { %4493 = sst [smem:[#allocation27_spill]] %s3632_s27  ;;  %s50_s8 = sadd.s32 1, %s3656_s7 }
  0x26   : > { %4494 = sst [smem:[#allocation28_spill]] %s3636_s28  ;;  %p51_p0 = scmp.ge.s32.totalorder %s50_s8, 2 }
  0x27   : > { %4495 = sst [smem:[#allocation29_spill]] %s3640_s6  ;;  %s53_s4 = sadd.s32 1, %s3660_s30 }
  0x28   : > { %4496 = sst [smem:[#allocation30_spill]] %s3644_s2  ;;  %s60_s1 = sadd.s32 1, %s3644_s2 }
  0x29   : > { %4497 = sst [smem:[#allocation31_spill]] %s3648_s29  ;;  %p67_p1 = scmp.ne.s32.totalorder %s3644_s2, %s3640_s6 }
  0x2a   : > { %4498 = sst [smem:[#allocation32_spill]] %s3652_s0  ;;  %s4580_s8 = smov (%p51_p0, %s50_s8), 0 }
  0x2b   : > { %4499 = sst [smem:[#allocation33_spill]] %s3656_s7  ;;  %s4582_s4 = smov (!%p51_p0, %s53_s4), %s3660_s30 }
  0x2c   : > { %4500 = sst [smem:[#allocation34_spill]] %s3660_s30  ;;  %p68_p2 = scmp.eq.s32.totalorder %s3664_s3, 0 }
  0x2d   : > { %4501 = sst [smem:[#allocation35_spill]] %s3664_s3  ;;  %p73_p3 = scmp.ne.s32.totalorder %s3640_s6, %s3636_s28 }
  0x2e   : > { %4502 = sst [smem:[#allocation36_spill]] %s4580_s8  ;;  %p55_p4 = scmp.ge.s32.totalorder %s4582_s4, 2 }
  0x2f   : > { %s307_s24 = ssub.s32 %s3656_s7, %s4580_s8  ;;  %p3876_p5 = por %p68_p2, %p67_p1 }
  0x30   : > { %p308_p6 = scmp.eq.s32.totalorder %s307_s24, 0  ;;  %s4584_s4 = smov (%p55_p4, %s4582_s4), 0 }
  0x31   : > { %4504 = sst [smem:[#allocation37_spill]] %s4584_s4  ;;  %s310_s21 = sadd.s32 1, %s3632_s27 }
  0x32   : > { %p317_p7 = scmp.ne.s32.totalorder %s3632_s27, %s3628_s26  ;;  %s57_s20 = ssub.s32 %s3660_s30, %s4584_s4 }
  0x33   : > { %p691_p8 = scmp.eq.s32.totalorder %s2747_s25, 3  ;;  %p58_p9 = scmp.eq.s32.totalorder %s57_s20, 0 }
  0x34   : > { %p3887_p10 = por %p317_p7, %p68_p2  ;;  %p3011_p12 = scmp.lt.s32.totalorder %s3664_s3, 4 }
  0x35   : > { %s3892_s8 = scalar_select %p308_p6, %s3632_s27, %s310_s21  }
  0x36   : > { %s3895_s16 = scalar_select %p58_p9, %s3644_s2, %s60_s1  }
  0x37   : > { %4506 = sst [smem:[#allocation38_spill]] %s3892_s8  ;;  %p3900_p11 = por %p691_p8, %p73_p3 }
  0x38   : > { %4507 = sst [smem:[#allocation39_spill]] %s3895_s16  ;;  %s726_s4 = sand.u32 1, %s3664_s3  }
  0x39   : > { %s4508_s24 = scalar_select %p3900_p11, 1, 0 }
  0x3a   : > { %s728_s25 = sand.u32 1, %s3644_s2   ;;  %s2752_s14 = sshll.u32 %s3660_s30, 3 }
  0x3b   : > { %4509 = sst [smem:[#allocation40_spill]] %s4508_s24  ;;  %s2751_s20 = sshll.u32 %s728_s25, 3 }
  0x3c   : > { %s4510_s0 = sld [smem:[#allocation45_spill]]  ;;  %s730_s21 = scalar_lea.vmem [#allocation5], %s2751_s20 }
  0x3d   : > { %s738_s8 = sshll.u32 %s730_s21, 4  ;;  %p3913_p13 = pnand %p3011_p12, %p3876_p5  ;;  %s739_s8 = int_to_ptr.vmem [resolvable:$true] %s738_s8 }
  0x3e   : > { %p3919_p0 = pnand %p3011_p12, %p3887_p10  ;;  %s748_s22 = scalar_lea.vmem [#allocation10], %s728_s25 }
  0x3f   : > { %s755_s20 = sshll.u32 %s748_s22, 4  ;;  %s765_s24 = scalar_lea.vmem [#allocation11], %s728_s25  ;;  %s756_s20 = int_to_ptr.vmem [resolvable:$true] %s755_s20 }
  0x40   : > { %s772_s2 = sshll.u32 %s765_s24, 4  ;;  %s4515_s10 = sld [smem:[#allocation55_spill]]  ;;  %s773_s2 = int_to_ptr.vmem [resolvable:$true] %s772_s2 }
  0x41   : > { %s4516_s11 = sld [smem:[#allocation56_spill]]  ;;  %s4452_s1 = smov 4  }
  0x42   : > { %s734_s23 = scalar_lea.hbm %s4510_s0, %s2752_s14  ;;  %s3927_s0 = scalar_lea.sflag [#allocation6], %s726_s4 }
  0x43   : > { %s736_s18 = sshll.u32 %s734_s23, 4  ;;  %s4513_s23 = sld [smem:[#allocation48_spill]]  ;;  %s737_s18 = int_to_ptr.hbm [resolvable:$true] %s736_s18 }
  0x44   : > { %2975 = dma.hbm_to_vmem [thread:$0]  (!%p3913_p13), %s737_s18, 128, %s739_s8, %s3927_s0  }
  0x45   : > { %s4514_s14 = sld [smem:[#allocation49_spill]]  ;;  %s3943_s18 = sand.u32 1, %s3632_s27  }
  0x46   : > { %s822_s25 = scalar_lea.vmem [#allocation12], %s3943_s18  ;;  %s839_s21 = scalar_lea.vmem [#allocation13], %s3943_s18 }
  0x47   : > { %s829_s24 = sshll.u32 %s822_s25, 4  ;;  %s846_s9 = sshll.u32 %s839_s21, 4  ;;  %s830_s24 = int_to_ptr.vmem [resolvable:$true] %s829_s24  ;;  %s847_s9 = int_to_ptr.vmem [resolvable:$true] %s846_s9 }
  0x48   : > { %s4517_s12 = sld [smem:[#allocation57_spill]]  ;;  %p323_p4 = scmp.ne.s32.totalorder %s3628_s26, %s3624_s5 }
  0x49   : > { %s751_s29 = scalar_lea.hbm %s4513_s23, %s3660_s30  ;;  %s4518_s13 = sld [smem:[#allocation58_spill]] }
  0x4a   : > { %s753_s19 = sshll.u32 %s751_s29, 4  ;;  %s4519_s15 = sld [smem:[#allocation60_spill]]  ;;  %s754_s19 = int_to_ptr.hbm [resolvable:$true] %s753_s19 }
  0x4b   : > { %2978 = dma.hbm_to_vmem [thread:$0]  (!%p3913_p13), %s754_s19, 16, %s756_s20, %s3927_s0  }
  0x4c   : > { %s768_s4 = scalar_lea.hbm %s4514_s14, %s3660_s30  ;;  %s825_s19 = scalar_lea.hbm %s4515_s10, %s3656_s7 }
  0x4d   : > { %s770_s23 = sshll.u32 %s768_s4, 4  ;;  %s827_s22 = sshll.u32 %s825_s19, 4  ;;  %s771_s23 = int_to_ptr.hbm [resolvable:$true] %s770_s23  ;;  %s828_s22 = int_to_ptr.hbm [resolvable:$true] %s827_s22 }
  0x4e   : > { %2981 = dma.hbm_to_vmem [thread:$0]  (!%p3913_p13), %s771_s23, 16, %s773_s2, %s3927_s0  }
  0x4f   : > { %2984 = dma.hbm_to_vmem [thread:$0]  (!%p3919_p0), %s828_s22, 16, %s830_s24, %s3927_s0  }
  0x50   : > { %s842_s20 = scalar_lea.hbm %s4516_s11, %s3656_s7  ;;  %s3959_s4 = sshll.u32 %s3943_s18, 4 }
  0x51   : > { %s844_s14 = sshll.u32 %s842_s20, 4  ;;  %s3965_s23 = sshll.u32 %s3656_s7, 4  ;;  %s845_s14 = int_to_ptr.hbm [resolvable:$true] %s844_s14 }
  0x52   : > { %2987 = dma.hbm_to_vmem [thread:$0]  (!%p3919_p0), %s845_s14, 16, %s847_s9, %s3927_s0  }
  0x53   : > { %s862_s19 = scalar_lea.hbm %s4517_s12, %s3965_s23  ;;  %s857_s22 = scalar_lea.vmem [#allocation14], %s3959_s4 }
  0x54   : > { %s865_s25 = sshll.u32 %s857_s22, 4  ;;  %s863_s24 = sshll.u32 %s862_s19, 4  ;;  %s866_s25 = int_to_ptr.vmem [resolvable:$true] %s865_s25  ;;  %s864_s24 = int_to_ptr.hbm [resolvable:$true] %s863_s24 }
  0x55   : > { %s4451_s2 = smov 64   ;;  %s884_s9 = scalar_lea.hbm %s4518_s13, %s3965_s23 }
  0x56   : > { %2990 = dma.hbm_to_vmem [thread:$0]  (!%p3919_p0), %s864_s24, 256, %s866_s25, %s3927_s0, %s4451_s2, %s4451_s2, %s4452_s1  }
  0x57   : > { %s879_s14 = scalar_lea.vmem [#allocation15], %s3959_s4  ;;  %s885_s29 = sshll.u32 %s884_s9, 4  ;;  %s886_s29 = int_to_ptr.hbm [resolvable:$true] %s885_s29 }
  0x58   : > { %s887_s8 = sshll.u32 %s879_s14, 4  ;;  %s914_s25 = scalar_lea.hbm %s4519_s15, %s3965_s23  ;;  %s888_s8 = int_to_ptr.vmem [resolvable:$true] %s887_s8 }
  0x59   : > { %2993 = dma.hbm_to_vmem [thread:$0]  (!%p3919_p0), %s886_s29, 256, %s888_s8, %s3927_s0, %s4451_s2, %s4451_s2, %s4452_s1  }
  0x5a   : > { %s909_s24 = scalar_lea.vmem [#allocation16], %s3959_s4  ;;  %s915_s21 = sshll.u32 %s914_s25, 4  ;;  %s916_s21 = int_to_ptr.hbm [resolvable:$true] %s915_s21 }
  0x5b   : > { %s917_s20 = sshll.u32 %s909_s24, 4  ;;  %s4520_s17 = sld [smem:[#allocation62_spill]]  ;;  %s918_s20 = int_to_ptr.vmem [resolvable:$true] %s917_s20 }
  0x5c   : > { %2996 = dma.hbm_to_vmem [thread:$0]  (!%p3919_p0), %s916_s21, 256, %s918_s20, %s3927_s0, %s4451_s2, %s4451_s2, %s4452_s1  }
  0x5d   : > { %s936_s29 = scalar_lea.vmem [#allocation17], %s3943_s18  ;;  %s4522_s21 = sld [smem:[#allocation63_spill]] }
  0x5e   : > { %s943_s19 = sshll.u32 %s936_s29, 4  ;;  %s954_s14 = scalar_lea.vmem [#allocation18], %s3959_s4  ;;  %s944_s19 = int_to_ptr.vmem [resolvable:$true] %s943_s19 }
  0x5f   : > { %s962_s2 = sshll.u32 %s954_s14, 4  ;;  %s4524_s29 = smov 64   ;;  %s963_s2 = int_to_ptr.vmem [resolvable:$true] %s962_s2 }
  0x60   : > { %s4020_s10 = sadd.s32 4294967295, %s3664_s3   ;;  %p2748_p6 = scmp.ge.s32.totalorder %s3664_s3, 1 }
  0x61   : > { %s939_s8 = scalar_lea.hbm %s4520_s17, %s3656_s7  ;;  %p74_p2 = scmp.eq.s32.totalorder %s4020_s10, 0 }
  0x62   : > { %s941_s22 = sshll.u32 %s939_s8, 4  ;;  %s4523_s8 = smov 4   ;;  %s942_s22 = int_to_ptr.hbm [resolvable:$true] %s941_s22 }
  0x63   : > { %2999 = dma.hbm_to_vmem [thread:$0]  (!%p3919_p0), %s942_s22, 16, %s944_s19, %s3927_s0  }
  0x64   : > { %s959_s9 = scalar_lea.hbm %s4522_s21, %s3965_s23  ;;  %p685_p5 = scmp.eq.s32.totalorder %s4020_s10, 3 }
  0x65   : > { %s960_s1 = sshll.u32 %s959_s9, 4  ;;  %p4032_p7 = por %p74_p2, %p73_p3  ;;  %s961_s1 = int_to_ptr.hbm [resolvable:$true] %s960_s1 }
  0x66   : > { %3002 = dma.hbm_to_vmem [thread:$0]  (!%p3919_p0), %s961_s1, 256, %s963_s2, %s3927_s0, %s4524_s29, %s4524_s29, %s4523_s8  }
  0x67   : > { %p4038_p8 = por %p323_p4, %p74_p2  ;;  %p4045_p9 = por %p685_p5, %p67_p1 }
  0x68   : > { %p698_p10 = scmp.lt.s32.totalorder %s3664_s3, 5  ;;  %s4529_s19 = sld [smem:[#allocation47_spill]] }
  0x69   : > { %s4527_s2 = scalar_select %p4045_p9, 1, 0 }
  0x6a   : > { %p4053_p3 = pnand %p2748_p6, %p698_p10  ;;  %s3668_s25 = smov [#allocation8]  }
  0x6b   : > { %4528 = sst [smem:[#allocation41_spill]] %s4527_s2  ;;  %s715_s20 = sshll.u32 %s3668_s25, 4  ;;  %s716_s20 = int_to_ptr.vmem [resolvable:$true] %s715_s20 }
  0x6c   : > { %p2968_p12 = pneg %p4053_p3  ;;  %s4531_s14 = sld [smem:[#allocation68_spill]] }
  0x6d   : > { %s1001_s5 = scalar_lea.vmem [#allocation19], %s3943_s18 }
  0x6e   : > { %s713_s22 = sshll.u32 %s4529_s19, 4  ;;  %p2969_p1 = pnand %p2968_p12, %p74_p2  ;;  %s714_s22 = int_to_ptr.hbm [resolvable:$true] %s713_s22 }
  0x6f   : > { %s1008_s1 = sshll.u32 %s1001_s5, 4  ;;  %s1009_s1 = int_to_ptr.vmem [resolvable:$true] %s1008_s1 }
  0x70   : > { %2971 = dma.hbm_to_vmem [thread:$0]  (!%p2969_p1), %s714_s22, 16, %s716_s20, [#allocation9]  }
  0x71   : > { %1017 = sbr.rel (%p4053_p3) target bundleno = 3600 (0xe10), region = 116 }
  0x72   : > { %s1004_s8 = scalar_lea.hbm %s4531_s14, %s3656_s7 }
  0x73   : > { %s1006_s29 = sshll.u32 %s1004_s8, 4  ;;  %s1007_s29 = int_to_ptr.hbm [resolvable:$true] %s1006_s29 }
  0x74   : > { %3005 = dma.hbm_to_vmem [thread:$0]  (!%p3919_p0), %s1007_s29, 16, %s1009_s1, %s3927_s0  }
  0x76   : > { %s1019_s19 = sand.u32 1, %s4020_s10   ;;  %s4073_s25 = sand.u32 1, %s3640_s6  }
  0x77   : > { %s4453_s21 = sshll.u32 %s4073_s25, 3  ;;  %s1020_s9 = scalar_lea.sflag [#allocation6], %s1019_s19 }
  0x78   : > { %s4078_s18 = scalar_lea.vmem [#allocation5], %s4453_s21 }
  0x79   : > { %3603 = dma.done.wait (%p4032_p7), %s1020_s9, 128  }
  0x7a   : > { %3605 = vsyncadd (%p4032_p7), %s1020_s9, 4294967168 }
  0x7b   : > { %3607 = dma.done.wait (%p74_p2), [#allocation9], 16  }
  0x7c   : > { %3609 = vsyncadd (%p74_p2), [#allocation9], 4294967280 }
  0x7d   : > { %3611 = dma.done.wait (%p4032_p7), %s1020_s9, 32  }
  0x7e   : > { %3613 = vsyncadd (%p4032_p7), %s1020_s9, 4294967264  ;;  %s4094_s0 = sand.u32 1, %s3628_s26  }
  0x7f   : > { %3615 = dma.done.wait (%p4038_p8), %s1020_s9, 1088  }
  0x80   : > { %3617 = vsyncadd (%p4038_p8), %s1020_s9, 4294966208  ;;  %s4532_s10 = sld [smem:[#allocation32_spill]]  ;;  %s4103_s4 = sshll.u32 %s4094_s0, 4 }
  0x81   : > { %s4533_s20 = sld [smem:[#allocation31_spill]]  ;;  %s1064_s11 = scalar_lea.vmem [#allocation13], %s4094_s0 }
  0x82   : > { %s4534_s5 = sld [smem:[#allocation50_spill]]  ;;  %s1084_s21 = scalar_lea.vmem [#allocation15], %s4103_s4 }
  0x83   : > { %s4536_s22 = sld [smem:[#allocation51_spill]]  ;;  %s1094_s6 = scalar_lea.vmem [#allocation16], %s4103_s4 }
  0x84   : > { %s4537_s12 = sld [smem:[#allocation52_spill]]  ;;  %s1103_s27 = scalar_lea.vmem [#allocation17], %s4094_s0 }
  0x85   : > { %s4538_s8 = sld [smem:[#allocation53_spill]]  ;;  %s1113_s15 = scalar_lea.vmem [#allocation18], %s4103_s4 }
  0x86   : > { %p1279_p13 = scmp.lt.s32.totalorder %s4532_s10, 1  ;;  %s4539_s17 = sld [smem:[#allocation54_spill]] }
  0x87   : > { %p1284_p0 = scmp.lt.s32.totalorder %s4533_s20, 1  ;;  %s4541_s30 = sld [smem:[#allocation59_spill]] }
  0x88   : > { %s4586_s10 = smov (!%p1279_p13, %s4532_s10), 1  ;;  %s4545_s29 = sld [smem:[#allocation65_spill]] }
  0x89   : > { %s4109_s14 = scalar_select %p1284_p0, %s4533_s20, 1 }
  0x8a   : > { %s2911_s23 = sshll.u32 %s4586_s10, 4  ;;  %s4547_s9 = sld [smem:[#allocation67_spill]] }
  0x8b   : > { %s4114_s1 = scalar_lea.vmem %s4534_s5, %s2911_s23  ;;  %s2912_s19 = sshll.u32 %s4109_s14, 4 }
  0x8c   : > { %4535 = sst [smem:[#allocation42_spill]] %s4114_s1  ;;  %s4120_s16 = scalar_lea.vmem %s4536_s22, %s2912_s19 }
  0x8d   : > { %s4125_s13 = scalar_lea.vmem %s4537_s12, %s2912_s19  ;;  %s4130_s23 = scalar_lea.vmem %s4538_s8, %s2912_s19 }
  0x8e   : > { %s4135_s24 = scalar_lea.vmem %s4539_s17, %s2912_s19  ;;  %s4140_s7 = scalar_lea.vmem %s4541_s30, %s2912_s19 }
  0x8f   : > { %4540 = sst [smem:[#allocation43_spill]] %s4135_s24  ;;  %s2917_s26 = sshll.u32 %s4109_s14, 5 }
  0x90   : > { %4542 = sst [smem:[#allocation44_spill]] %s4140_s7  ;;  %s4154_s5 = scalar_lea.vmem %s4545_s29, %s2917_s26 }
  0x91   : > { %s4546_s1 = sld [smem:[#allocation66_spill]]  ;;  %s1325_s7 = scalar_lea.vmem %s4547_s9, %s4109_s14 }
  0x92   : > { %s1074_s12 = scalar_lea.vmem [#allocation14], %s4103_s4  ;;  %s1122_s10 = scalar_lea.vmem [#allocation19], %s4094_s0 }
  0x93   : > { %s4548_s8 = sshll.u32 %s4073_s25, 3  ;;  %p2787_p2 = scmp.ne.s32.totalorder %s4533_s20, 0 }
  0x94   : > { %s4173_s24 = scalar_lea.vmem [#allocation20], %s4548_s8  ;;  %s4549_s26 = scalar_lea.vmem (!%p2787_p2), [#allocation10], %s4073_s25 }
  0x95   : > { %1330 = sbr.rel (%p2787_p2) target bundleno = 424 (0x1a8), region = 168  ;;  %s4550_s28 = scalar_lea.vmem (!%p2787_p2), [#allocation11], %s4073_s25 }
  0x97   : > { %s1322_s22 = scalar_lea.vmem %s4546_s1, %s4109_s14 }
  0x9a   : > { %v1331_v0 = vld [vmem:[%s4078_s18] sm:$0xff]  ;;  %vm1334_vm0 = vcmask 261120   ;;  %v3669_v2 = vmov 32.0   ;;  %v1373_v15 = vlaneseq  ;;  %v3670_v16 = vmov 0   ;;  %s4551_s18 = sld [smem:[#allocation46_spill]] }
  0x9b   : > { %v1335_v1 = vsel %vm1334_vm0, %v1331_v0, 0.0  ;;  %3117 = vrcp.f32 %v3669_v2  ;;  %v1378_v14 = vld [vmem:[%s4549_s26] sm:$0x1]  ;;  %v3671_v22 = vmov -1e+09   ;;  %vm1385_vm7 = vcmask 64512  }
  0x9c   : > { %1336 = vadd.xlane.f32.xlu0 %v1335_v1  ;;  %vm1379_vm2 = vcmp.gt.f32.partialorder %v1378_v14, 0.0  ;;  %v1374_v18 = vshrl.u32 %v1373_v15, 7  ;;  %v1376_v19 = vand.u32 127, %v1373_v15  ;;  %v1387_v21 = vld [vmem:[%s4550_s28] sm:$0x1]  ;;  %vm1390_vm8 = vcmask 73728  }
  0x9d   : > { %v1380_v17 = vsel %vm1379_vm2, 1, %v3670_v16  ;;  %vm1388_vm6 = vcmp.gt.f32.partialorder %v1387_v21, 0.0  ;;  %v3116_v36 = vld [vmem:[#allocation8] ss:$0 sm:$0xff] }
  0x9e   : > { %v1381_v20 = vperm.slane %v1380_v17, 0  ;;  %vm1377_vm3 = vcmp.ge.s32.totalorder %v1374_v18, %v1376_v19  ;;  %v1389_v24 = vsel %vm1388_vm6, 0.0, %v3671_v22 }
  0x9f   : > { %1391 = vst.msk [vmem:[#allocation4] sm:$0x1] %vm1390_vm8, %v1389_v24 }
  0xa0   : > { %vm1382_vm4 = vcmp.eq.s32.totalorder %v1381_v20, 1  ;;  %v3115_v34 = vld [vmem:[%s4551_s18] ss:$0 sm:$0xff] }
  0xa1   : > { %v3118_v3 = vpop.eup %3117  ;;  %vm1383_vm5 = vmand %vm1377_vm3, %vm1382_vm4 }
  0xa2   : > { %v1339_v4 = vmul.f32 32.0, %v3118_v3  ;;  %vm1343_vm1 = vweird.f32 %v3118_v3  ;;  %v1384_v23 = vsel %vm1383_vm5, 0.0, %v3671_v22 }
  0xa3   : > { %1386 = vst.msk [vmem:[#allocation3] sm:$0xff] %vm1385_vm7, %v1384_v23 }
  0xa4   : > { %v1340_v5 = vsub.f32 1.0, %v1339_v4 }
  0xa6   : > { %v1341_v6 = vmul.f32 %v3118_v3, %v1340_v5 }
  0xa8   : > { %v1342_v7 = vadd.f32 %v3118_v3, %v1341_v6 }
  0xaa   : > { %v1344_v8 = vsel %vm1343_vm1, %v3118_v3, %v1342_v7 }
 0x10f   : > { %v1337_v9 = vpop.xlane.xlu0 %1336 }
 0x110   : > { %v1345_v10 = vmul.f32 %v1344_v8, %v1337_v9 }
 0x112   : > { %v1346_v11 = vsub.f32 %v1331_v0, %v1345_v10 }
 0x114   : > { %v1347_v12 = vmul.f32 %v1346_v11, %v1346_v11 }
 0x116   : > { %v1348_v13 = vsel %vm1334_vm0, %v1347_v12, 0.0 }
 0x117   : > { %1349 = vadd.xlane.f32.xlu0 %v1348_v13 }
 0x18a   : > { %v1350_v25 = vpop.xlane.xlu0 %1349 }
 0x18b   : > { %v1351_v26 = vmul.f32 %v1350_v25, %v1344_v8 }
 0x18d   : > { %v1352_v27 = vadd.f32 1e-06, %v1351_v26 }
 0x18f   : > { %3119 = vrsqrt.f32 %v1352_v27  ;;  %vm1359_vm10 = vweird.f32 %v1352_v27 }
 0x195   : > { %v3120_v28 = vpop.eup %3119 }
 0x196   : > { %v1354_v29 = vmul.f32 %v3120_v28, %v1352_v27  ;;  %vm1360_vm9 = vweird.f32 %v3120_v28 }
 0x197   : > { %vm1361_vm11 = vmor %vm1359_vm10, %vm1360_vm9 }
 0x198   : > { %v1355_v30 = vmul.f32 %v3120_v28, %v1354_v29 }
 0x19a   : > { %v1356_v31 = vmul.f32 0.5, %v1355_v30 }
 0x19c   : > { %v1357_v32 = vsub.f32 1.5, %v1356_v31 }
 0x19e   : > { %v1358_v33 = vmul.f32 %v3120_v28, %v1357_v32 }
 0x1a0   : > { %v1362_v35 = vsel %vm1361_vm11, %v3120_v28, %v1358_v33 }
 0x1a1   : > { %v1363_v37 = vmul.f32 %v1362_v35, %v1346_v11 }
 0x1a3   : > { %v1367_v38 = vmul.f32 %v3115_v34, %v1363_v37 }
 0x1a5   : > { %v1371_v39 = vadd.f32 %v3116_v36, %v1367_v38 }
 0x1a7   : > { %1372 = vst.msk [vmem:[#allocation2] sm:$0xff] %vm1334_vm0, %v1371_v39 }
 0x1a8 PF: > { %v2919_v40 = vld [vmem:[%s4120_s16 + $0x8] sm:$0xff]  ;;  %v2918_v42 = vld [vmem:[%s4120_s16] sm:$0xff]  ;;  %vm1425_vm12 = vcmask 261120   ;;  %vm1496_vm13 = vcmask 64512   ;;  %s3673_s16 = smov 120   ;;  %s3674_s20 = smov 104  }
 0x1a9   : > { %v2921_v41 = vld [vmem:[%s4125_s13 + $0x8] sm:$0xff]  ;;  %v2920_v43 = vld [vmem:[%s4125_s13] sm:$0xff]  ;;  %1435 = vmatpush.bf16.msra.mxu0 %v2919_v40  ;;  %s3672_s13 = smov 112   ;;  %vm1531_vm14 = vcmask 1043456   ;;  %s4552_s1 = sld [smem:[#allocation43_spill]]  ;;  %vm1732_vm15 = vcmask 130048  }
 0x1aa   : > { %1461 = vmatpush.bf16.msra.mxu1 %v2921_v41  ;;  %v1393_v63 = vld [vmem:[#allocation3] sm:$0xff]  ;;  %v2922_v5 = vld [vmem:[%s4130_s23] sm:$0xff]  ;;  %s3676_s8 = smov 24   ;;  %s3677_s29 = smov 16   ;;  %vm1734_vm0 = vcmask 195584   ;;  %vm1934_vm5 = vcmask 80896  }
 0x1ab   : > { %v2923_v4 = vld [vmem:[%s4130_s23 + $0x8] sm:$0xff]  ;;  %s3675_s23 = smov 8   ;;  %s4553_s17 = sld [smem:[#allocation42_spill]]  ;;  %vm1950_vm6 = vcmask 1044480   ;;  %vm2287_vm10 = vcmask 523264  }
 0x1ac   : > { %1486 = vmatpush.bf16.msra.mxu2 %v2923_v4  ;;  %s4554_s30 = scalar_lea.vmem [#allocation12], %s4094_s0  ;;  %s4555_s19 = sld [smem:[#allocation44_spill]] }
 0x1ad   : > { %1436 = vmatpush.bf16.msra.mxu0 %v2918_v42  ;;  %s4556_s9 = sld [smem:[#allocation61_spill]] }
 0x1ae   : > { %v4191_v44 = vld [vmem:[#allocation2] sm:$0xff]  ;;  %1462 = vmatpush.bf16.msra.mxu1 %v2920_v43  ;;  %s4562_s18 = sld [smem:[#allocation31_spill]] }
 0x1af   : > { %v1412_v45 = vpack.c.bf16 %v4191_v44, %v4191_v44 }
 0x1b0   : > { %1487 = vmatpush.bf16.msra.mxu2 %v2922_v5 }
 0x1b1   : > { %2796 = vmatmul.msk.bf16.vlgmr.msra.gmra.mxu0 %vm1425_vm12, %v1412_v45  ;;  %2805 = vmatmul.msk.bf16.vlgmr.msra.gmra.mxu1 %vm1425_vm12, %v1412_v45 }
 0x1b3   : > { %2814 = vmatmul.msk.bf16.vlgmr.msra.gmra.mxu2 %vm1425_vm12, %v1412_v45 }
 0x1b4   : > { %p2902_p4 = scmp.ne.s32.totalorder %s4562_s18, 1 }
 0x22e   : > { %v1438_v46 = vpop.f32.mrf.mxu0  ;;  %v1464_v47 = vpop.f32.mrf.mxu1 }
 0x22f   : > { %v1442_v48 = vmul.f32 0.35355338, %v1438_v46  ;;  %v1494_v49 = vpack.c.bf16 %v1464_v47, %v1464_v47 }
 0x231   : > { %v1493_v50 = vpack.c.bf16 %v1442_v48, %v1442_v48  ;;  %1609 = vrot.lane.b32.xlu1 %v1494_v49, %s3672_s13  ;;  %1552 = vrot.lane.b32.xlu0 %v1494_v49, %s3673_s16  ;;  %v1501_v51 = vsel %vm1496_vm13, %v1494_v49, 0 }
 0x232   : > { %1510 = vmatpush.bf16.xpose.msra.mxu3 %v1501_v51 }
 0x233   : > { %1607 = vrot.lane.b32.xlu2 %v1493_v50, %s3672_s13 }
 0x236   : > { %v1440_v52 = vpop.f32.mrf.mxu0  ;;  %v1466_v53 = vpop.f32.mrf.mxu1 }
 0x237   : > { %v1489_v23 = vpop.f32.mrf.mxu2 }
 0x238   : > { %v1495_v24 = vpack.c.bf16 %v1489_v23, %v1489_v23  ;;  %v2929_v23 = vld [vmem:[%s1084_s21 + $0x8] sm:$0xff] }
 0x239   : > { %1665 = vrot.lane.b32.xlu1 %v1494_v49, %s3674_s20  ;;  %1549 = vrot.lane.b32.xlu0 %v1493_v50, %s3673_s16 }
 0x23a   : > { %2815 = vmatmul.msk.bf16.vlgmr.msra.gmra.mxu3 %vm1496_vm13, %v1493_v50  ;;  %v1533_v25 = vsel %vm1531_vm14, %v1495_v24, 0 }
 0x23b   : > { %1663 = vrot.lane.b32.xlu2 %v1493_v50, %s3674_s20  ;;  %1542 = vmatpush.bf16.msrb.mxu0 %v1533_v25  ;;  %v1802_v25 = vld [vmem:[%s4553_s17] sm:$0xff] }
 0x23f   : > { %v1491_v28 = vpop.f32.mrf.mxu2 }
 0x28d   : > { %v1608_v58 = vpop.permute.xlu2 %1607 }
 0x295   : > { %v1664_v62 = vpop.permute.xlu2 %1663 }
 0x2a3   : > { %v1610_v54 = vpop.permute.xlu1 %1609  ;;  %v1553_v55 = vpop.permute.xlu0 %1552 }
 0x2a4   : > { %v1558_v56 = vsel %vm1496_vm13, %v1553_v55, 0  ;;  %v1615_v57 = vsel %vm1496_vm13, %v1610_v54, 0 }
 0x2a5   : > { %1567 = vmatpush.bf16.xpose.msrb.mxu1 %v1558_v56  ;;  %1624 = vmatpush.bf16.xpose.msrb.mxu3 %v1615_v57 }
 0x2ab   : > { %v1666_v59 = vpop.permute.xlu1 %1665  ;;  %v1550_v60 = vpop.permute.xlu0 %1549 }
 0x2ac   : > { %v1671_v61 = vsel %vm1496_vm13, %v1666_v59, 0  ;;  %2817 = vmatmul.msk.bf16.vlgmr.msrb.gmra.mxu1 %vm1496_vm13, %v1550_v60  ;;  %2819 = vmatmul.msk.bf16.vlgmr.msrb.gmra.mxu3 %vm1496_vm13, %v1608_v58 }
 0x2ad   : > { %1680 = vmatpush.bf16.xpose.msra.mxu1 %v1671_v61 }
 0x2b5   : > { %1875 = vmatpush.bf16.msrb.mxu1 %v2929_v23 }
 0x2bc   : > { %2821 = vmatmul.msk.bf16.vlgmr.msra.gmra.mxu1 %vm1496_vm13, %v1664_v62 }
 0x2bd   : > { %v1512_v0 = vpop.f32.mrf.mxu3 }
 0x2be   : > { %v1513_v1 = vadd.f32 %v1512_v0, %v1393_v63 }
 0x2c0   : > { %v1516_v2 = vsel %vm1496_vm13, %v1513_v1, -inf }
 0x2c1   : > { %1517 = vmax.xlane.f32.xlu1 %v1516_v2 }
 0x2c5   : > { %v1514_v3 = vpop.f32.mrf.mxu3 }
 0x329   : > { %v1569_v6 = vpop.f32.mrf.mxu1 }
 0x32a   : > { %v1570_v7 = vadd.f32 %v1569_v6, %v1393_v63 }
 0x32c   : > { %v1573_v8 = vsel %vm1496_vm13, %v1570_v7, -inf }
 0x32d   : > { %1574 = vmax.xlane.f32.xlu0 %v1573_v8 }
 0x32f   : > { %v1626_v9 = vpop.f32.mrf.mxu3 }
 0x330   : > { %v1627_v19 = vadd.f32 %v1626_v9, %v1393_v63  ;;  %v2925_v9 = vld [vmem:[%s4552_s1 + $0x8] sm:$0xff] }
 0x331   : > { %v1571_v10 = vpop.f32.mrf.mxu1  ;;  %1758 = vmatpush.bf16.msra.mxu3 %v2925_v9  ;;  %v2931_v9 = vld [vmem:[%s4555_s19 + $0x8] sm:$0xff] }
 0x332   : > { %v1630_v22 = vsel %vm1496_vm13, %v1627_v19, -inf  ;;  %v2924_v10 = vld [vmem:[%s4552_s1] sm:$0xff] }
 0x334   : > { %v1518_v11 = vpop.xlane.xlu1 %1517 }
 0x335   : > { %v1519_v12 = vsub.f32 %v1513_v1, %v1518_v11  ;;  %1759 = vmatpush.bf16.msra.mxu3 %v2924_v10  ;;  %v2930_v10 = vld [vmem:[%s4555_s19] sm:$0xff] }
 0x337   : > { %v1520_v13 = vmul.f32 1.442695, %v1519_v12  ;;  %v1628_v14 = vpop.f32.mrf.mxu3 }
 0x339   : > { %3130 = vpow2.f32 %v1520_v13  ;;  %v1682_v15 = vpop.f32.mrf.mxu1 }
 0x33a   : > { %v1683_v16 = vadd.f32 %v1682_v15, %v1393_v63 }
 0x33c   : > { %v1686_v17 = vsel %vm1496_vm13, %v1683_v16, -inf }
 0x33d   : > { %1687 = vmax.xlane.f32.xlu2 %v1686_v17 }
 0x33f   : > { %v3131_v18 = vpop.eup %3130 }
 0x340   : > { %v1522_v20 = vsel %vm1496_vm13, %v3131_v18, 0.0 }
 0x341   : > { %1523 = vadd.xlane.f32.xlu1 %v1522_v20  ;;  %v1684_v21 = vpop.f32.mrf.mxu1 }
 0x345   : > { %1631 = vmax.xlane.f32.xlu2 %v1630_v22  ;;  %v3678_v22 = vmov 32.0  }
 0x35d   : > { %1586 = vrot.lane.b32.xlu2 %v1495_v24, %s3673_s16 }
 0x3a0   : > { %v1575_v26 = vpop.xlane.xlu0 %1574 }
 0x3a1   : > { %v1576_v27 = vsub.f32 %v1570_v7, %v1575_v26  ;;  %v1803_v26 = vld [vmem:[%s4553_s17 + $0x8] sm:$0x3] }
 0x3a2   : > { %v4250_v28 = vpack.c.bf16 %v1803_v26, %v1802_v25 }
 0x3a3   : > { %v1577_v29 = vmul.f32 1.442695, %v1576_v27 }
 0x3a5   : > { %3132 = vpow2.f32 %v1577_v29 }
 0x3ab   : > { %v3133_v30 = vpop.eup %3132 }
 0x3ac   : > { %v1579_v31 = vsel %vm1496_vm13, %v3133_v30, 0.0 }
 0x3ad   : > { %1580 = vadd.xlane.f32.xlu0 %v1579_v31 }
 0x3b0   : > { %v1688_v32 = vpop.xlane.xlu2 %1687 }
 0x3b1   : > { %v1689_v33 = vsub.f32 %v1683_v16, %v1688_v32 }
 0x3b3   : > { %v1690_v34 = vmul.f32 1.442695, %v1689_v33 }
 0x3b4   : > { %v1524_v35 = vpop.xlane.xlu1 %1523 }
 0x3b5   : > { %3134 = vpow2.f32 %v1690_v34 }
 0x3b6   : > { %3136 = vrcp.f32 %v1524_v35 }
 0x3b8   : > { %v1632_v36 = vpop.xlane.xlu2 %1631 }
 0x3b9   : > { %v1633_v37 = vsub.f32 %v1627_v19, %v1632_v36 }
 0x3bb   : > { %v3135_v38 = vpop.eup %3134  ;;  %v1634_v39 = vmul.f32 1.442695, %v1633_v37 }
 0x3bc   : > { %v3137_v40 = vpop.eup %3136  ;;  %v1692_v41 = vsel %vm1496_vm13, %v3135_v38, 0.0 }
 0x3bd   : > { %v1526_v42 = vmul.f32 %v3137_v40, %v3131_v18  ;;  %3138 = vpow2.f32 %v1634_v39  ;;  %1693 = vadd.xlane.f32.xlu0 %v1692_v41  ;;  %v2926_v39 = vld [vmem:[%s1074_s12] sm:$0xff] }
 0x3bf   : > { %v1527_v43 = vpack.c.bf16 %v1526_v42, %v1526_v42 }
 0x3c0   : > { %v1587_v47 = vpop.permute.xlu2 %1586 }
 0x3c1   : > { %2816 = vmatmul.msk.bf16.vlgmr.msrb.gmra.mxu0 %vm1496_vm13, %v1527_v43  ;;  %v1592_v48 = vsel %vm1531_vm14, %v1587_v47, 0 }
 0x3c2   : > { %1601 = vmatpush.bf16.msrb.mxu2 %v1592_v48 }
 0x3c3   : > { %v3139_v45 = vpop.eup %3138 }
 0x3c4   : > { %v1636_v46 = vsel %vm1496_vm13, %v3139_v45, 0.0 }
 0x3c5   : > { %1637 = vadd.xlane.f32.xlu1 %v1636_v46 }
 0x3d1   : > { %1698 = vrot.lane.b32.xlu0 %v1495_v24, %s3674_s20 }
 0x3de   : > { %1642 = vrot.lane.b32.xlu1 %v1495_v24, %s3672_s13  ;;  %v2928_v24 = vld [vmem:[%s1084_s21] sm:$0xff] }
 0x3df   : > { %1876 = vmatpush.bf16.msrb.mxu1 %v2928_v24 }
 0x3e2   : > { %2849 = vmatmul.msk.bf16.vlgmr.msrb.gmra.mxu1 %vm1425_vm12, %v4250_v28 }
 0x420   : > { %v1581_v49 = vpop.xlane.xlu0 %1580 }
 0x421   : > { %3140 = vrcp.f32 %v1581_v49 }
 0x427   : > { %v3141_v50 = vpop.eup %3140 }
 0x428   : > { %v1583_v51 = vmul.f32 %v3141_v50, %v3133_v30 }
 0x42a   : > { %v1584_v52 = vpack.c.bf16 %v1583_v51, %v1583_v51 }
 0x42c   : > { %2818 = vmatmul.msk.bf16.vlgmr.msrb.gmra.mxu2 %vm1496_vm13, %v1584_v52 }
 0x430   : > { %v1694_v53 = vpop.xlane.xlu0 %1693 }
 0x431   : > { %3142 = vrcp.f32 %v1694_v53 }
 0x437   : > { %v3143_v55 = vpop.eup %3142 }
 0x438   : > { %v1696_v56 = vmul.f32 %v3143_v55, %v3135_v38  ;;  %v1638_v57 = vpop.xlane.xlu1 %1637  ;;  %v2927_v38 = vld [vmem:[%s1074_s12 + $0x8] sm:$0xff] }
 0x439   : > { %3144 = vrcp.f32 %v1638_v57 }
 0x43a   : > { %v1697_v60 = vpack.c.bf16 %v1696_v56, %v1696_v56  ;;  %3146 = vrcp.f32 %v3678_v22  ;;  %v3122_v56 = vld [vmem:[%s1064_s11] ss:$0 sm:$0xff]  ;;  %s4557_s11 = scalar_lea.vmem %s4556_s9, %s4109_s14 }
 0x43e   : > { %v1544_v54 = vpop.f32.mrf.mxu0 }
 0x43f   : > { %v3145_v62 = vpop.eup %3144 }
 0x440   : > { %v1640_v63 = vmul.f32 %v3145_v62, %v3139_v45  ;;  %v3147_v27 = vpop.eup %3146 }
 0x441   : > { %v1769_v29 = vmul.f32 32.0, %v3147_v27  ;;  %vm1773_vm1 = vweird.f32 %v3147_v27 }
 0x442   : > { %v1641_v2 = vpack.c.bf16 %v1640_v63, %v1640_v63 }
 0x443   : > { %v1699_v58 = vpop.permute.xlu0 %1698 }
 0x444   : > { %v1704_v59 = vsel %vm1531_vm14, %v1699_v58, 0 }
 0x445   : > { %1713 = vmatpush.bf16.msra.mxu2 %v1704_v59 }
 0x446   : > { %v1546_v61 = vpop.f32.mrf.mxu0 }
 0x448   : > { %2822 = vmatmul.msk.bf16.vlgmr.msra.gmra.mxu2 %vm1496_vm13, %v1697_v60 }
 0x449   : > { %1901 = vmatpush.bf16.msrb.mxu2 %v2931_v9 }
 0x44d   : > { %1902 = vmatpush.bf16.msrb.mxu2 %v2930_v10 }
 0x450   : > { %v1643_v0 = vpop.permute.xlu1 %1642 }
 0x451   : > { %v1648_v1 = vsel %vm1531_vm14, %v1643_v0, 0 }
 0x452   : > { %1657 = vmatpush.bf16.msra.mxu0 %v1648_v1 }
 0x455   : > { %2820 = vmatmul.msk.bf16.vlgmr.msra.gmra.mxu0 %vm1496_vm13, %v1641_v2 }
 0x456   : > { %1846 = vmatpush.bf16.msrb.mxu0 %v2927_v38 }
 0x458   : > { %2858 = vmatmul.msk.bf16.vlgmr.msrb.gmra.mxu2 %vm1425_vm12, %v4250_v28 }
 0x45a   : > { %1847 = vmatpush.bf16.msrb.mxu0 %v2926_v39 }
 0x45f   : > { %v1878_v40 = vpop.f32.mrf.mxu1 }
 0x467   : > { %v1880_v45 = vpop.f32.mrf.mxu1 }
 0x468   : > { %v1910_v46 = vpack.c.bf16 %v1880_v45, %v1878_v40 }
 0x46a   : > { %v1919_v47 = vsel %vm1496_vm13, %v1910_v46, 0 }
 0x46b   : > { %1928 = vmatpush.bf16.xpose.msrb.mxu3 %v1919_v47 }
 0x4af   : > { %v1603_v3 = vpop.f32.mrf.mxu2 }
 0x4b0   : > { %1720 = vrot.lane.b32.xlu2 %v1603_v3, %s3675_s23 }
 0x4b7   : > { %v1605_v4 = vpop.f32.mrf.mxu2 }
 0x4cb   : > { %v1715_v5 = vpop.f32.mrf.mxu2 }
 0x4cc   : > { %1728 = vrot.lane.b32.xlu2 %v1715_v5, %s3676_s8 }
 0x4d2   : > { %v1659_v6 = vpop.f32.mrf.mxu0 }
 0x4d3   : > { %v1717_v7 = vpop.f32.mrf.mxu2  ;;  %1724 = vrot.lane.b32.xlu0 %v1659_v6, %s3677_s29 }
 0x4d4   : > { %1971 = vrot.lane.b32.xlu2 %v1910_v46, %s3673_s16 }
 0x4da   : > { %v1661_v8 = vpop.f32.mrf.mxu0 }
 0x4dc   : > { %2028 = vrot.lane.b32.xlu2 %v1910_v46, %s3672_s13 }
 0x50a   : > { %v1721_v11 = vpop.permute.xlu2 %1720 }
 0x50b   : > { %v1731_v12 = vsel %vm1496_vm13, %v1544_v54, %v1721_v11  ;;  %v3121_v54 = vld [vmem:[%s4554_s30] ss:$0 sm:$0xff] }
 0x526   : > { %v1729_v14 = vpop.permute.xlu2 %1728 }
 0x52e   : > { %v1972_v61 = vpop.permute.xlu2 %1971 }
 0x52f   : > { %v1977_v62 = vsel %vm1496_vm13, %v1972_v61, 0 }
 0x530   : > { %1986 = vmatpush.bf16.xpose.msra.mxu1 %v1977_v62 }
 0x536   : > { %v2029_v63 = vpop.permute.xlu2 %2028 }
 0x537   : > { %v2034_v0 = vsel %vm1496_vm13, %v2029_v63, 0 }
 0x545   : > { %v1725_v13 = vpop.permute.xlu0 %1724 }
 0x546   : > { %v1733_v15 = vsel %vm1732_vm15, %v1731_v12, %v1725_v13  ;;  %v3123_v12 = vld [vmem:[#allocation4] ss:$0 sm:$0xff] }
 0x547   : > { %v1735_v16 = vsel %vm1734_vm0, %v1733_v15, %v1729_v14 }
 0x548   : > { %v1736_v17 = vpack.c.bf16 %v1735_v16, %v1735_v16 }
 0x54a   : > { %2831 = vmatmul.msk.bf16.vlgmr.msra.gmra.mxu3 %vm1425_vm12, %v1736_v17 }
 0x54b   : > { %2043 = vmatpush.bf16.xpose.msra.mxu3 %v2034_v0 }
 0x5cd   : > { %v1761_v18 = vpop.f32.mrf.mxu3 }
 0x5ce   : > { %v1762_v19 = vadd.f32 %v1761_v18, %v4191_v44  ;;  %v1770_v44 = vsub.f32 1.0, %v1769_v29 }
 0x5d0   : > { %v1765_v20 = vsel %vm1425_vm12, %v1762_v19, 0.0  ;;  %v1771_v30 = vmul.f32 %v3147_v27, %v1770_v44 }
 0x5d1   : > { %1766 = vadd.xlane.f32.xlu1 %v1765_v20 }
 0x5d2   : > { %v1772_v31 = vadd.f32 %v3147_v27, %v1771_v30 }
 0x5d4   : > { %v4254_v32 = vsel %vm1773_vm1, %v3147_v27, %v1772_v31 }
 0x5d5   : > { %v1763_v21 = vpop.f32.mrf.mxu3 }
 0x644   : > { %v1767_v33 = vpop.xlane.xlu1 %1766 }
 0x645   : > { %v1775_v34 = vmul.f32 %v4254_v32, %v1767_v33 }
 0x647   : > { %v1776_v35 = vsub.f32 %v1762_v19, %v1775_v34  ;;  %v1904_v34 = vpop.f32.mrf.mxu2 }
 0x649   : > { %v1777_v36 = vmul.f32 %v1776_v35, %v1776_v35 }
 0x64b   : > { %v1778_v37 = vsel %vm1425_vm12, %v1777_v36, 0.0 }
 0x64c   : > { %1779 = vadd.xlane.f32.xlu0 %v1778_v37 }
 0x6bf   : > { %v1780_v41 = vpop.xlane.xlu0 %1779 }
 0x6c0   : > { %v1781_v42 = vmul.f32 %v1780_v41, %v4254_v32 }
 0x6c2   : > { %v1782_v43 = vadd.f32 1e-06, %v1781_v42 }
 0x6c4   : > { %3148 = vrsqrt.f32 %v1782_v43  ;;  %vm1789_vm3 = vweird.f32 %v1782_v43 }
 0x6ca   : > { %v3149_v48 = vpop.eup %3148 }
 0x6cb   : > { %v1784_v49 = vmul.f32 %v3149_v48, %v1782_v43  ;;  %vm1790_vm2 = vweird.f32 %v3149_v48 }
 0x6cc   : > { %vm1791_vm4 = vmor %vm1789_vm3, %vm1790_vm2 }
 0x6cd   : > { %v1785_v50 = vmul.f32 %v3149_v48, %v1784_v49 }
 0x6cf   : > { %v1786_v51 = vmul.f32 0.5, %v1785_v50 }
 0x6d1   : > { %v1787_v52 = vsub.f32 1.5, %v1786_v51 }
 0x6d3   : > { %v1788_v53 = vmul.f32 %v3149_v48, %v1787_v52 }
 0x6d5   : > { %v1792_v55 = vsel %vm1791_vm4, %v3149_v48, %v1788_v53 }
 0x6d6   : > { %v1793_v57 = vmul.f32 %v1792_v55, %v1776_v35  ;;  %v1906_v35 = vpop.f32.mrf.mxu2 }
 0x6d7   : > { %v1911_v36 = vpack.c.bf16 %v1906_v35, %v1904_v34 }
 0x6d8   : > { %v1797_v58 = vmul.f32 %v3121_v54, %v1793_v57 }
 0x6d9   : > { %v1952_v37 = vsel %vm1950_vm6, %v1911_v36, 0 }
 0x6da   : > { %v4270_v59 = vadd.f32 %v3122_v56, %v1797_v58  ;;  %1961 = vmatpush.bf16.msra.mxu0 %v1952_v37 }
 0x6dc   : > { %v1823_v60 = vpack.c.bf16 %v4270_v59, %v4270_v59 }
 0x6de   : > { %2840 = vmatmul.msk.bf16.vlgmr.msrb.gmra.mxu0 %vm1425_vm12, %v1823_v60 }
 0x75b   : > { %v1849_v1 = vpop.f32.mrf.mxu0 }
 0x75c   : > { %v1853_v2 = vmul.f32 0.35355338, %v1849_v1 }
 0x75e   : > { %v1909_v3 = vpack.c.bf16 %v1853_v2, %v1853_v2 }
 0x760   : > { %2082 = vrot.lane.b32.xlu1 %v1909_v3, %s3674_s20  ;;  %1968 = vrot.lane.b32.xlu2 %v1909_v3, %s3673_s16 }
 0x761   : > { %2859 = vmatmul.msk.bf16.vlgmr.msrb.gmra.mxu3 %vm1496_vm13, %v1909_v3 }
 0x763   : > { %v1851_v4 = vpop.f32.mrf.mxu0 }
 0x768   : > { %2084 = vrot.lane.b32.xlu2 %v1910_v46, %s3674_s20 }
 0x770   : > { %2026 = vrot.lane.b32.xlu2 %v1909_v3, %s3672_s13 }
 0x7ba   : > { %v1969_v5 = vpop.permute.xlu2 %1968 }
 0x7bb   : > { %2861 = vmatmul.msk.bf16.vlgmr.msra.gmra.mxu1 %vm1496_vm13, %v1969_v5 }
 0x7c2   : > { %v2085_v6 = vpop.permute.xlu2 %2084 }
 0x7c3   : > { %v2090_v7 = vsel %vm1496_vm13, %v2085_v6, 0 }
 0x7c4   : > { %2099 = vmatpush.bf16.xpose.msrb.mxu1 %v2090_v7 }
 0x7ca   : > { %v2027_v8 = vpop.permute.xlu2 %2026 }
 0x7cb   : > { %2863 = vmatmul.msk.bf16.vlgmr.msra.gmra.mxu3 %vm1496_vm13, %v2027_v8 }
 0x7d2   : > { %v2083_v11 = vpop.permute.xlu1 %2082 }
 0x7d3   : > { %2865 = vmatmul.msk.bf16.vlgmr.msrb.gmra.mxu1 %vm1496_vm13, %v2083_v11 }
 0x7e4   : > { %v1930_v13 = vpop.f32.mrf.mxu3 }
 0x7e5   : > { %v1931_v14 = vadd.f32 %v3123_v12, %v1930_v13 }
 0x7e7   : > { %v1935_v15 = vsel %vm1934_vm5, %v1931_v14, -inf }
 0x7e8   : > { %1936 = vmax.xlane.f32.xlu2 %v1935_v15 }
 0x7ec   : > { %v1932_v16 = vpop.f32.mrf.mxu3 }
 0x838   : > { %v1988_v17 = vpop.f32.mrf.mxu1 }
 0x839   : > { %v1989_v18 = vadd.f32 %v3123_v12, %v1988_v17 }
 0x83b   : > { %v1992_v19 = vsel %vm1934_vm5, %v1989_v18, -inf }
 0x83c   : > { %1993 = vmax.xlane.f32.xlu0 %v1992_v19 }
 0x840   : > { %v1990_v20 = vpop.f32.mrf.mxu1 }
 0x84e   : > { %v2045_v21 = vpop.f32.mrf.mxu3 }
 0x84f   : > { %v2046_v22 = vadd.f32 %v3123_v12, %v2045_v21  ;;  %v2933_v21 = vld [vmem:[%s1094_s6 + $0x8] sm:$0xff] }
 0x850   : > { %v2101_v23 = vpop.f32.mrf.mxu1  ;;  %2175 = vmatpush.bf16.msrb.mxu3 %v2933_v21 }
 0x851   : > { %v2049_v24 = vsel %vm1934_vm5, %v2046_v22, -inf  ;;  %v2102_v25 = vadd.f32 %v3123_v12, %v2101_v23 }
 0x852   : > { %2050 = vmax.xlane.f32.xlu0 %v2049_v24 }
 0x853   : > { %v2105_v28 = vsel %vm1934_vm5, %v2102_v25, -inf }
 0x856   : > { %v2047_v26 = vpop.f32.mrf.mxu3 }
 0x858   : > { %v2103_v27 = vpop.f32.mrf.mxu1 }
 0x85a   : > { %2106 = vmax.xlane.f32.xlu0 %v2105_v28 }
 0x85b   : > { %v1937_v29 = vpop.xlane.xlu2 %1936 }
 0x85c   : > { %v1938_v44 = vsub.f32 %v1931_v14, %v1937_v29 }
 0x85e   : > { %v1939_v30 = vmul.f32 1.442695, %v1938_v44 }
 0x860   : > { %3150 = vpow2.f32 %v1939_v30 }
 0x866   : > { %v3151_v31 = vpop.eup %3150 }
 0x867   : > { %v1941_v33 = vsel %vm1934_vm5, %v3151_v31, 0.0 }
 0x868   : > { %1942 = vadd.xlane.f32.xlu0 %v1941_v33 }
 0x87c   : > { %2005 = vrot.lane.b32.xlu0 %v1911_v36, %s3673_s16 }
 0x884   : > { %2117 = vrot.lane.b32.xlu0 %v1911_v36, %s3674_s20 }
 0x8af   : > { %v1994_v38 = vpop.xlane.xlu0 %1993 }
 0x8b0   : > { %v1995_v39 = vsub.f32 %v1989_v18, %v1994_v38 }
 0x8b2   : > { %v1996_v40 = vmul.f32 1.442695, %v1995_v39  ;;  %v2935_v39 = vld [vmem:[%s1113_s15 + $0x8] sm:$0xff] }
 0x8b4   : > { %3152 = vpow2.f32 %v1996_v40  ;;  %v2934_v40 = vld [vmem:[%s1113_s15] sm:$0xff]  ;;  %s4558_s15 = sld [smem:[#allocation64_spill]] }
 0x8ba   : > { %v3153_v41 = vpop.eup %3152  ;;  %s4559_s26 = scalar_lea.vmem %s4558_s15, %s4109_s14 }
 0x8bb   : > { %v1998_v42 = vsel %vm1934_vm5, %v3153_v41, 0.0 }
 0x8bc   : > { %1999 = vadd.xlane.f32.xlu1 %v1998_v42 }
 0x8c5   : > { %v2051_v43 = vpop.xlane.xlu0 %2050 }
 0x8c6   : > { %v2052_v45 = vsub.f32 %v2046_v22, %v2051_v43  ;;  %v2932_v22 = vld [vmem:[%s1094_s6] sm:$0xff] }
 0x8c7   : > { %2176 = vmatpush.bf16.msrb.mxu3 %v2932_v22  ;;  %v2938_v43 = vld [vmem:[%s4154_s5 + $0x10] sm:$0xff] }
 0x8c8   : > { %v2053_v46 = vmul.f32 1.442695, %v2052_v45 }
 0x8ca   : > { %3154 = vpow2.f32 %v2053_v46 }
 0x8cd   : > { %v2107_v47 = vpop.xlane.xlu0 %2106 }
 0x8ce   : > { %v2108_v48 = vsub.f32 %v2102_v25, %v2107_v47 }
 0x8d0   : > { %v3155_v49 = vpop.eup %3154  ;;  %v2109_v50 = vmul.f32 1.442695, %v2108_v48 }
 0x8d1   : > { %v2055_v51 = vsel %vm1934_vm5, %v3155_v49, 0.0 }
 0x8d2   : > { %3156 = vpow2.f32 %v2109_v50  ;;  %2056 = vadd.xlane.f32.xlu2 %v2055_v51 }
 0x8d8   : > { %v3157_v52 = vpop.eup %3156 }
 0x8d9   : > { %v2111_v53 = vsel %vm1934_vm5, %v3157_v52, 0.0 }
 0x8da   : > { %2112 = vadd.xlane.f32.xlu2 %v2111_v53 }
 0x8db   : > { %v1943_v54 = vpop.xlane.xlu0 %1942 }
 0x8dc   : > { %3158 = vrcp.f32 %v1943_v54  ;;  %v3125_v54 = vld [vmem:[%s1103_s27] ss:$0 sm:$0xff] }
 0x8e2   : > { %v3159_v55 = vpop.eup %3158 }
 0x8e3   : > { %v1945_v56 = vmul.f32 %v3159_v55, %v3151_v31 }
 0x8e5   : > { %v1946_v57 = vpack.c.bf16 %v1945_v56, %v1945_v56 }
 0x8e7   : > { %2860 = vmatmul.msk.bf16.vlgmr.msra.gmra.mxu0 %vm1934_vm5, %v1946_v57 }
 0x8ee   : > { %v2006_v58 = vpop.permute.xlu0 %2005 }
 0x8ef   : > { %v2011_v60 = vsel %vm1950_vm6, %v2006_v58, 0 }
 0x8f0   : > { %2020 = vmatpush.bf16.msra.mxu2 %v2011_v60  ;;  %v2937_v60 = vld [vmem:[%s4154_s5 + $0x8] sm:$0xff] }
 0x8f2   : > { %2061 = vrot.lane.b32.xlu2 %v1911_v36, %s3672_s13 }
 0x8f6   : > { %v2118_v61 = vpop.permute.xlu0 %2117 }
 0x8f7   : > { %v2123_v62 = vsel %vm1950_vm6, %v2118_v61, 0  ;;  %v2936_v61 = vld [vmem:[%s4154_s5] sm:$0xff] }
 0x8f8   : > { %2132 = vmatpush.bf16.msrb.mxu2 %v2123_v62  ;;  %v3126_v62 = vld [vmem:[%s4559_s26] ss:$0 sm:$0xff] }
 0x92f   : > { %v2000_v63 = vpop.xlane.xlu1 %1999 }
 0x930   : > { %3160 = vrcp.f32 %v2000_v63 }
 0x936   : > { %v3161_v0 = vpop.eup %3160 }
 0x937   : > { %v2002_v1 = vmul.f32 %v3161_v0, %v3153_v41 }
 0x939   : > { %v2003_v2 = vpack.c.bf16 %v2002_v1, %v2002_v1 }
 0x93b   : > { %2862 = vmatmul.msk.bf16.vlgmr.msra.gmra.mxu2 %vm1934_vm5, %v2003_v2 }
 0x945   : > { %v2057_v3 = vpop.xlane.xlu2 %2056 }
 0x946   : > { %3162 = vrcp.f32 %v2057_v3 }
 0x94c   : > { %v3163_v5 = vpop.eup %3162 }
 0x94d   : > { %v2113_v4 = vpop.xlane.xlu2 %2112  ;;  %v2059_v7 = vmul.f32 %v3163_v5, %v3155_v49 }
 0x94e   : > { %3164 = vrcp.f32 %v2113_v4  ;;  %v3127_v4 = vld [vmem:[%s1322_s22] ss:$0 sm:$0xff] }
 0x94f   : > { %v2060_v12 = vpack.c.bf16 %v2059_v7, %v2059_v7 }
 0x954   : > { %v3165_v6 = vpop.eup %3164 }
 0x955   : > { %v2115_v8 = vmul.f32 %v3165_v6, %v3157_v52  ;;  %v2062_v9 = vpop.permute.xlu2 %2061  ;;  %v3124_v52 = vld [vmem:[%s4557_s11] ss:$0 sm:$0xff] }
 0x956   : > { %v2067_v10 = vsel %vm1950_vm6, %v2062_v9, 0 }
 0x957   : > { %v2116_v11 = vpack.c.bf16 %v2115_v8, %v2115_v8  ;;  %2076 = vmatpush.bf16.msrb.mxu0 %v2067_v10 }
 0x959   : > { %2866 = vmatmul.msk.bf16.vlgmr.msrb.gmra.mxu2 %vm1934_vm5, %v2116_v11 }
 0x95a   : > { %2864 = vmatmul.msk.bf16.vlgmr.msrb.gmra.mxu0 %vm1934_vm5, %v2060_v12 }
 0x95b   : > { %2242 = vmatpush.bf16.msra.mxu0 %v2935_v39 }
 0x95f   : > { %2243 = vmatpush.bf16.msra.mxu0 %v2934_v40 }
 0x964   : > { %v1963_v13 = vpop.f32.mrf.mxu0 }
 0x96c   : > { %v1965_v14 = vpop.f32.mrf.mxu0 }
 0x9be   : > { %v2022_v15 = vpop.f32.mrf.mxu2 }
 0x9bf   : > { %2139 = vrot.lane.b32.xlu0 %v2022_v15, %s3675_s23 }
 0x9c6   : > { %v2024_v16 = vpop.f32.mrf.mxu2 }
 0x9d7   : > { %v2078_v17 = vpop.f32.mrf.mxu0 }
 0x9d8   : > { %2143 = vrot.lane.b32.xlu1 %v2078_v17, %s3677_s29 }
 0x9dc   : > { %v2134_v18 = vpop.f32.mrf.mxu2 }
 0x9dd   : > { %2147 = vrot.lane.b32.xlu0 %v2134_v18, %s3676_s8 }
 0x9df   : > { %v2080_v19 = vpop.f32.mrf.mxu0 }
 0x9e4   : > { %v2136_v20 = vpop.f32.mrf.mxu2 }
 0xa31   : > { %v2140_v23 = vpop.permute.xlu0 %2139 }
 0xa32   : > { %v2150_v25 = vsel %vm1496_vm13, %v1963_v13, %v2140_v23 }
 0xa4a   : > { %v2144_v24 = vpop.permute.xlu1 %2143 }
 0xa4b   : > { %v2151_v26 = vsel %vm1732_vm15, %v2150_v25, %v2144_v24  ;;  %v3128_v24 = vld [vmem:[%s1325_s7] ss:$0 sm:$0xff] }
 0xa4f   : > { %v2148_v27 = vpop.permute.xlu0 %2147 }
 0xa50   : > { %v2152_v28 = vsel %vm1734_vm0, %v2151_v26, %v2148_v27  ;;  %v3129_v26 = vld [vmem:[%s1122_s10] ss:$0 sm:$0xff] }
 0xa51   : > { %v2153_v29 = vpack.c.bf16 %v2152_v28, %v2152_v28 }
 0xa53   : > { %2875 = vmatmul.msk.bf16.vlgmr.msrb.gmra.mxu3 %vm1425_vm12, %v2153_v29 }
 0xad6   : > { %v2178_v44 = vpop.f32.mrf.mxu3 }
 0xad7   : > { %v2179_v30 = vadd.f32 %v2178_v44, %v4270_v59  ;;  %v2939_v59 = vld [vmem:[%s4154_s5 + $0x18] sm:$0xff] }
 0xad8   : > { %2295 = vmatpush.bf16.msra.mxu1 %v2939_v59 }
 0xad9   : > { %v2182_v31 = vsel %vm1425_vm12, %v2179_v30, 0.0 }
 0xada   : > { %2183 = vadd.xlane.f32.xlu0 %v2182_v31 }
 0xadc   : > { %2296 = vmatpush.bf16.msra.mxu1 %v2938_v43 }
 0xade   : > { %v2180_v33 = vpop.f32.mrf.mxu3 }
 0xae0   : > { %2297 = vmatpush.bf16.msra.mxu1 %v2937_v60 }
 0xae4   : > { %2298 = vmatpush.bf16.msra.mxu1 %v2936_v61 }
 0xb4d   : > { %v2184_v34 = vpop.xlane.xlu0 %2183 }
 0xb4e   : > { %v2185_v35 = vmul.f32 %v2184_v34, %v4254_v32 }
 0xb50   : > { %v2186_v36 = vsub.f32 %v2179_v30, %v2185_v35 }
 0xb52   : > { %v2187_v37 = vmul.f32 %v2186_v36, %v2186_v36 }
 0xb54   : > { %v2188_v38 = vsel %vm1425_vm12, %v2187_v37, 0.0 }
 0xb55   : > { %2189 = vadd.xlane.f32.xlu2 %v2188_v38 }
 0xbc8   : > { %v2190_v41 = vpop.xlane.xlu2 %2189 }
 0xbc9   : > { %v2191_v42 = vmul.f32 %v2190_v41, %v4254_v32 }
 0xbcb   : > { %v2192_v45 = vadd.f32 1e-06, %v2191_v42 }
 0xbcd   : > { %3166 = vrsqrt.f32 %v2192_v45  ;;  %vm2199_vm8 = vweird.f32 %v2192_v45 }
 0xbd3   : > { %v3167_v46 = vpop.eup %3166 }
 0xbd4   : > { %v2194_v47 = vmul.f32 %v3167_v46, %v2192_v45  ;;  %vm2200_vm7 = vweird.f32 %v3167_v46 }
 0xbd5   : > { %vm2201_vm9 = vmor %vm2199_vm8, %vm2200_vm7 }
 0xbd6   : > { %v2195_v48 = vmul.f32 %v3167_v46, %v2194_v47 }
 0xbd8   : > { %v2196_v49 = vmul.f32 0.5, %v2195_v48 }
 0xbda   : > { %v2197_v50 = vsub.f32 1.5, %v2196_v49 }
 0xbdc   : > { %v2198_v51 = vmul.f32 %v3167_v46, %v2197_v50 }
 0xbde   : > { %v2202_v53 = vsel %vm2201_vm9, %v3167_v46, %v2198_v51 }
 0xbdf   : > { %v2203_v55 = vmul.f32 %v2202_v53, %v2186_v36 }
 0xbe1   : > { %v2207_v56 = vmul.f32 %v3124_v52, %v2203_v55 }
 0xbe3   : > { %v2211_v57 = vadd.f32 %v3125_v54, %v2207_v56 }
 0xbe5   : > { %v2212_v58 = vpack.c.bf16 %v2211_v57, %v2211_v57 }
 0xbe7   : > { %2884 = vmatmul.msk.bf16.vlgmr.msra.gmra.mxu0 %vm1425_vm12, %v2212_v58 }
 0xc64   : > { %v2245_v63 = vpop.f32.mrf.mxu0 }
 0xc65   : > { %v2246_v0 = vadd.f32 %v3126_v62, %v2245_v63 }
 0xc67   : > { %v2249_v1 = vmax.f32 %v2246_v0, 0.0 }
 0xc69   : > { %v2250_v2 = vpack.c.bf16 %v2249_v1, %v2249_v1 }
 0xc6b   : > { %2901 = vmatmul.msk.bf16.vlgmr.msra.gmra.mxu1 %vm2287_vm10, %v2250_v2 }
 0xc6c   : > { %v2247_v3 = vpop.f32.mrf.mxu0 }
 0xce8   : > { %v2300_v5 = vpop.f32.mrf.mxu1 }
 0xce9   : > { %v2301_v6 = vadd.f32 %v3127_v4, %v2300_v5 }
 0xceb   : > { %v2304_v7 = vadd.f32 %v2301_v6, %v2211_v57 }
 0xced   : > { %v2307_v8 = vsel %vm1425_vm12, %v2304_v7, 0.0 }
 0xcee   : > { %2308 = vadd.xlane.f32.xlu1 %v2307_v8 }
 0xcf0   : > { %v2302_v9 = vpop.f32.mrf.mxu1 }
 0xd61   : > { %v2309_v10 = vpop.xlane.xlu1 %2308 }
 0xd62   : > { %v2310_v11 = vmul.f32 %v2309_v10, %v4254_v32 }
 0xd64   : > { %v2311_v12 = vsub.f32 %v2304_v7, %v2310_v11 }
 0xd66   : > { %v2312_v13 = vmul.f32 %v2311_v12, %v2311_v12 }
 0xd68   : > { %v2313_v14 = vsel %vm1425_vm12, %v2312_v13, 0.0 }
 0xd69   : > { %2314 = vadd.xlane.f32.xlu0 %v2313_v14 }
 0xddc   : > { %v2315_v15 = vpop.xlane.xlu0 %2314 }
 0xddd   : > { %v2316_v16 = vmul.f32 %v2315_v15, %v4254_v32 }
 0xddf   : > { %v2317_v17 = vadd.f32 1e-06, %v2316_v16 }
 0xde1   : > { %3168 = vrsqrt.f32 %v2317_v17  ;;  %vm2324_vm13 = vweird.f32 %v2317_v17 }
 0xde7   : > { %v3169_v18 = vpop.eup %3168 }
 0xde8   : > { %v2319_v19 = vmul.f32 %v3169_v18, %v2317_v17  ;;  %vm2325_vm11 = vweird.f32 %v3169_v18 }
 0xde9   : > { %vm2326_vm14 = vmor %vm2324_vm13, %vm2325_vm11 }
 0xdea   : > { %v2320_v20 = vmul.f32 %v3169_v18, %v2319_v19 }
 0xdec   : > { %v2321_v21 = vmul.f32 0.5, %v2320_v20 }
 0xdee   : > { %v2322_v22 = vsub.f32 1.5, %v2321_v21 }
 0xdf0   : > { %v2323_v23 = vmul.f32 %v3169_v18, %v2322_v22 }
 0xdf2   : > { %v2327_v25 = vsel %vm2326_vm14, %v3169_v18, %v2323_v23 }
 0xdf3   : > { %v2328_v32 = vmul.f32 %v2327_v25, %v2311_v12 }
 0xdf5   : > { %v2332_v27 = vmul.f32 %v3128_v24, %v2328_v32  ;;  %2341 = sbr.rel (%p2902_p4) target bundleno = 3579 (0xdfb), region = 172 }
 0xdf7   : > { %v2336_v28 = vadd.f32 %v3129_v26, %v2332_v27 }
 0xdf9   : > { %2337 = vst.msk [vmem:[#allocation2] sm:$0xff] %vm1425_vm12, %v2336_v28 }
 0xdfa   : > { %2342 = vst.msk [vmem:[%s4173_s24] sm:$0xff] %vm1425_vm12, %v2336_v28 }
 0xdfb PF: > { %s4563_s13 = sld [smem:[#allocation32_spill]]  ;;  %s2356_s1 = sshll.u32 %s4173_s24, 4  ;;  %s2357_s1 = int_to_ptr.vmem [resolvable:$true] %s2356_s1 }
 0xdfc   : > { %s4565_s10 = sld [smem:[#allocation69_spill]]  ;;  %s2344_s8 = scalar_lea.sflag [#allocation7], %s4073_s25 }
 0xe01   : > { %s2904_s14 = sshll.u32 %s4563_s13, 3 }
 0xe02   : > { %s2354_s20 = scalar_lea.hbm %s4565_s10, %s2904_s14  ;;  %s3550_s6 = scalar_lea.hbm %s4565_s10, 16 }
 0xe03   : > { %s2358_s23 = sshll.u32 %s2354_s20, 4  ;;  %s2359_s23 = int_to_ptr.hbm [resolvable:$true] %s2358_s23 }
 0xe04   : > { %s3544_s29 = sshra.s32 %s2359_s23, 4  ;;  %s3545_s29 = int_to_ptr.hbm [resolvable:$true] %s3544_s29 }
 0xe05   : > { %s3546_s17 = scalar_lea.hbm %s3545_s29, 8  ;;  %p3551_p8 = scmp.lt.s32.totalorder %s3545_s29, %s4565_s10 }
 0xe06   : > { %p3547_p5 = scmp.ne.s32.totalorder %s3545_s29, %s3546_s17  ;;  %p3552_p10 = scmp.lt.s32.totalorder %s3550_s6, %s3546_s17 }
 0xe08   : > { %p3548_p6 = pnand %p3547_p5, %p4045_p9  ;;  %p3553_p3 = por %p3552_p10, %p3551_p8 }
 0xe0a   : > { %p3549_p7 = pneg %p3548_p6 }
 0xe0c   : > { %p3554_p12 = pnand %p3553_p3, %p3549_p7 }
 0xe0e   : > { %3557 = shalt.err (!%p3554_p12)
}
 0xe0f   : > { %2966 = dma.vmem_to_hbm [thread:$0]  (%p4045_p9), %s2357_s1, 128, %s2359_s23, %s2344_s8  }
 0xe10 PF: > { %s4566_s25 = sld [smem:[#allocation35_spill]] }
 0xe11   : > { %s4567_s24 = sld [smem:[#allocation28_spill]] }
 0xe16   : > { %p3013_p1 = scmp.ge.s32.totalorder %s4566_s25, 2 }
 0xe17   : > { %s2370_s12 = sand.u32 1, %s4567_s24  }
 0xe18   : > { %p3007_p13 = pnand %p3013_p1, %p3900_p11  ;;  %s2371_s21 = scalar_lea.sflag [#allocation7], %s2370_s12 }
 0xe1a   : > { %p3008_p0 = pneg %p3007_p13 }
 0xe1c   : > { %3619 = dma.done.wait (%p3008_p0), %s2371_s21, 128  }
 0xe1d   : > { %3621 = vsyncadd (%p3008_p0), %s2371_s21, 4294967168  ;;  %s41_s3 = sadd.s32 1, %s4566_s25   ;;  %s4569_s5 = sld [smem:[#allocation26_spill]] }
 0xe1e   : > { %p38_p2 = scmp.ge.s32.totalorder %s41_s3, 6   ;;  %s4570_s26 = sld [smem:[#allocation27_spill]] }
 0xe1f   : > { %s4571_s27 = sld [smem:[#allocation38_spill]] }
 0xe20   : > { %s4572_s28 = sld [smem:[#allocation29_spill]] }
 0xe21   : > { %s4573_s6 = sld [smem:[#allocation30_spill]] }
 0xe22   : > { %s4574_s2 = sld [smem:[#allocation39_spill]]  ;;  %40 = sbr.rel (!%p38_p2) target bundleno = 36 (0x24), region = 316 }
 0xe23   : > { %s4575_s29 = sld [smem:[#allocation33_spill]] }
 0xe24   : > { %s4576_s0 = sld [smem:[#allocation34_spill]] }
 0xe25   : > { %s4577_s7 = sld [smem:[#allocation36_spill]] }
 0xe26   : > { %s4578_s30 = sld [smem:[#allocation37_spill]] }
 0xe27   :  { %2377 = vsyncpa [#allocation6], 1 }
 0xe28   :  { %2379 = vsyncpa [#allocation6 + $0x1], 1 }
 0xe29   :  { %2380 = vsyncpa [#allocation9], 1 }
 0xe2a   :  { %2381 = vsyncpa [#allocation7], 1 }
 0xe2b   :  { %2383 = vsyncpa [#allocation7 + $0x1], 1 }

</bundles_post_ra>
